<compile_context>
chip_gen: v7x
topology: tpu7x:2x2x1
jax: 0.10.0
libtpu: 0.0.40
codegen_flags: <defaults>
</compile_context>

<pallas_src>
import functools
import math

import jax
import jax.numpy as jnp
from jax import lax
from jax.experimental import pallas as pl
from jax.experimental.pallas import tpu as pltpu


# --------------------------- helpers (plain JAX glue) ---------------------------

# Constants from the Deep-Exemplar colorization repo's util.py (uncenter_l).
_L_NORM = 1.0
_L_MEAN = 50.0


def uncenter_l(l):
    return l * _L_NORM + _L_MEAN


def _interpolate_nearest(x, scale_factor):
    """F.interpolate(x, scale_factor=s) with the default mode='nearest'."""
    if scale_factor == 1:
        return x
    N, C, H, W = x.shape
    Ho, Wo = int(H * scale_factor), int(W * scale_factor)
    rows = jnp.floor(jnp.arange(Ho) * (H / Ho)).astype(jnp.int32)
    cols = jnp.floor(jnp.arange(Wo) * (W / Wo)).astype(jnp.int32)
    return x[:, :, rows[:, None], cols[None, :]]


# --------------------------------- Pallas kernel ---------------------------------

def _shift2d(x, dy, dx, H, W):
    """Circular shift: out[y, x] = x[(y + dy) mod H, (x + dx) mod W] (XLU rotates)."""
    out = x
    if dy:
        out = pltpu.roll(out, (-dy) % H, axis=0)   # sublane rotate
    if dx:
        out = pltpu.roll(out, (-dx) % W, axis=1)   # lane rotate
    return out


def _weighted_avg_color_kernel(xlab_ref, xpred_ref, o_ref, *, H, W, P, inv_alpha):
    # xlab_ref:  (1, 3, H, W)  [l, a, b]            (lane-aligned, no halo)
    # xpred_ref: (1, 3, H, W)  [l_p, a_p, b_p]      (only a_p, b_p are read)
    # o_ref:     (1, 2, H, W)
    c = P // 2
    s = math.sqrt(inv_alpha)   # fold 1/alpha into the 3 distance channels, once

    # Separate (H, W) channel planes straight off the refs.
    l_c = xlab_ref[0, 0] * (_L_NORM * s) + (_L_MEAN * s)   # uncenter_l, scaled
    a_c = xlab_ref[0, 1] * s
    b_c = xlab_ref[0, 2] * s
    ap_c = xpred_ref[0, 1]
    bp_c = xpred_ref[0, 2]

    # --- border bookkeeping, hoisted out of the tap loop -------------------------
    # Masks come from rolling index planes with the *same* shifts as the data,
    # so they always match pltpu.roll's actual data movement.
    row_idx = lax.broadcasted_iota(jnp.int32, (H, W), 0)
    col_idx = lax.broadcasted_iota(jnp.int32, (H, W), 1)

    def _ok(shifted, base):
        d = shifted - base
        return (d >= -c) & (d <= c)     # wrapped entries have |d| = size-|off| > c

    row_ok = {o: _ok(_shift2d(row_idx, o, 0, H, W), row_idx)
              for o in range(-c, c + 1) if o != 0}
    col_ok = {o: _ok(_shift2d(col_idx, 0, o, H, W), col_idx)
              for o in range(-c, c + 1) if o != 0}
    tap_mask = {}
    for dy in range(-c, c + 1):
        for dx in range(-c, c + 1):
            if dy == 0 and dx == 0:
                continue
            m = row_ok[dy] if dy else None
            if dx:
                m = col_ok[dx] if m is None else (m & col_ok[dx])
            tap_mask[(dy, dx)] = m

    # F.unfold zero-pads the *values*: an out-of-bounds tap still contributes
    # exp(-||center||^2 / alpha) to the softmax denominator (and 0 on top).
    w_pad = jnp.exp(-(l_c * l_c + a_c * a_c + b_c * b_c))
    rv = jnp.minimum(row_idx, c) + jnp.minimum((H - 1) - row_idx, c) + 1
    cv = jnp.minimum(col_idx, c) + jnp.minimum((W - 1) - col_idx, c) + 1
    n_oob = (P * P - rv * cv).astype(jnp.float32)

    # Center tap skipped in the loop: d == 0  =>  weight == 1 exactly.
    sum_w = 1.0 + n_oob * w_pad
    sum_a = ap_c
    sum_b = bp_c

    # Static unrolled loop over the non-center taps (XLU rolls, VPU math, EUP exp).
    for dy in range(-c, c + 1):
        # Hoist the sublane (row) rotations out of the dx loop.
        l_r = _shift2d(l_c, dy, 0, H, W)
        a_r = _shift2d(a_c, dy, 0, H, W)
        b_r = _shift2d(b_c, dy, 0, H, W)
        ap_r = _shift2d(ap_c, dy, 0, H, W)
        bp_r = _shift2d(bp_c, dy, 0, H, W)
        for dx in range(-c, c + 1):
            if dy == 0 and dx == 0:
                continue
            l_k = _shift2d(l_r, 0, dx, H, W)
            a_k = _shift2d(a_r, 0, dx, H, W)
            b_k = _shift2d(b_r, 0, dx, H, W)
            ap_k = _shift2d(ap_r, 0, dx, H, W)
            bp_k = _shift2d(bp_r, 0, dx, H, W)

            dl = l_k - l_c
            da = a_k - a_c
            db = b_k - b_c
            w = jnp.exp(-(dl * dl + da * da + db * db))        # EUP
            w = jnp.where(tap_mask[(dy, dx)], w, 0.0)          # wrapped taps -> 0
            sum_w = sum_w + w
            sum_a = sum_a + w * ap_k
            sum_b = sum_b + w * bp_k

    # TODO(synk): pl.reciprocal(sum_w, approx=True) once the 1e-4 self-test
    #             tolerance is relaxed; exact divide keeps the output faithful.
    inv = 1.0 / sum_w
    o_ref[0, 0] = (sum_a * inv).astype(o_ref.dtype)
    o_ref[0, 1] = (sum_b * inv).astype(o_ref.dtype)


# ------------------------------------ wrapper ------------------------------------

def weighted_average_color(x_lab, x_lab_predict, patch_size=3, alpha=1.0,
                           scale_factor=1):
    """Equivalent of WeightedAverage_color.forward(x_lab, x_lab_predict, ...)."""
    x_lab = _interpolate_nearest(x_lab, scale_factor)
    N, _, H, W = x_lab.shape
    P = int(patch_size)
    assert P % 2 == 1, "patch_size must be odd (centered patch)"

    out_dtype = x_lab_predict.dtype
    x_lab = x_lab.astype(jnp.float32)
    x_pred = x_lab_predict.astype(jnp.float32)

    kernel = functools.partial(_weighted_avg_color_kernel,
                               H=H, W=W, P=P, inv_alpha=1.0 / float(alpha))

    # NOTE: keep W a multiple of 128 for real workloads (lane-dense stores).
    out = pl.pallas_call(
        kernel,
        out_shape=jax.ShapeDtypeStruct((N, 2, H, W), out_dtype),
        grid=(N,),
        in_specs=[pl.BlockSpec((1, 3, H, W), lambda n: (n, 0, 0, 0)),
                  pl.BlockSpec((1, 3, H, W), lambda n: (n, 0, 0, 0))],
        out_specs=pl.BlockSpec((1, 2, H, W), lambda n: (n, 0, 0, 0)),
        compiler_params=pltpu.CompilerParams(
            dimension_semantics=("parallel",),      # v7x: both TCs when N > 1
            vmem_limit_bytes=32 * 1024 * 1024),
    )(x_lab, x_pred)
    return out


# -------------------------------- pure-JAX reference --------------------------------

def _reference(x_lab, x_lab_predict, patch_size=3, alpha=1.0, scale_factor=1):
    x_lab = _interpolate_nearest(x_lab, scale_factor)
    P = int(patch_size)
    pad = P // 2
    l = uncenter_l(x_lab[:, 0:1])
    a = x_lab[:, 1:2]
    b = x_lab[:, 2:3]
    ap = x_lab_predict[:, 1:2]
    bp = x_lab_predict[:, 2:3]

    def unfold(x):                       # (N,1,H,W) -> (N,P*P,H,W), zero pad
        N, _, H, W = x.shape
        xp = jnp.pad(x, ((0, 0), (0, 0), (pad, pad), (pad, pad)))
        return jnp.stack([xp[:, 0, dy:dy + H, dx:dx + W]
                          for dy in range(P) for dx in range(P)], axis=1)

    ll, la, lb = unfold(l), unfold(a), unfold(b)
    lap, lbp = unfold(ap), unfold(bp)
    d = (ll - l) ** 2 + (la - a) ** 2 + (lb - b) ** 2
    corr = jax.nn.softmax(-d / alpha, axis=1)
    out_a = jnp.sum(corr * lap, axis=1, keepdims=True)
    out_b = jnp.sum(corr * lbp, axis=1, keepdims=True)
    return jnp.concatenate([out_a, out_b], axis=1)


# ------------------------------------- main -------------------------------------

if __name__ == "__main__":
    key = jax.random.PRNGKey(0)
    k1, k2 = jax.random.split(key)

    # Small LAB-like inputs: batch=2, 3 channels, 16 x 128 spatial
    # (W = 128 keeps the output lane-dense for the store path).
    N, H, W = 2, 16, 128
    chan_scale = jnp.array([50.0, 20.0, 20.0], jnp.float32).reshape(1, 3, 1, 1)
    x_lab = jax.random.uniform(k1, (N, 3, H, W), jnp.float32, -1.0, 1.0) * chan_scale
    x_lab_predict = (jax.random.uniform(k2, (N, 3, H, W), jnp.float32, -1.0, 1.0)
                     * chan_scale)

    # alpha=1 is the module default; alpha=2 also exercises the in-kernel
    # 1/alpha folding and the zero-pad border accounting.
    for alpha in (1.0, 2.0):
        fwd = jax.jit(functools.partial(weighted_average_color,
                                        patch_size=3, alpha=alpha, scale_factor=1))
        out = jax.block_until_ready(fwd(x_lab, x_lab_predict))
        ref = jax.block_until_ready(_reference(x_lab, x_lab_predict,
                                               patch_size=3, alpha=alpha))
        assert out.shape == (N, 2, H, W)
        assert bool(jnp.all(jnp.isfinite(out)))
        err = float(jnp.max(jnp.abs(out - ref)))
        assert bool(jnp.allclose(out, ref, atol=1e-4, rtol=1e-4)), \
            f"max abs err {err} (alpha={alpha})"

    print("KERNEL_OK")
</pallas_src>

<mosaic_0001>
module attributes {stable_mosaic.version = 11 : i64} {
  func.func @_weighted_avg_color_kernel(%arg0: i32, %arg1: memref<1x3x16x128xf32, #tpu.memory_space<vmem>>, %arg2: memref<1x3x16x128xf32, #tpu.memory_space<vmem>>, %arg3: memref<1x2x16x128xf32, #tpu.memory_space<vmem>>) attributes {dimension_semantics = [#tpu.dimension_semantics<parallel>], iteration_bounds = array<i64: 2>, scalar_prefetch = 0 : i64, scratch_operands = 0 : i64, tpu.core_type = #tpu.core_type<tc>, window_params = [{transform_indices = @transform_0, window_bounds = array<i64: 1, 3, 16, 128>}, {transform_indices = @transform_1, window_bounds = array<i64: 1, 3, 16, 128>}, {transform_indices = @transform_2, window_bounds = array<i64: 1, 2, 16, 128>}]} {
    %c0 = arith.constant 0 : index
    %c0_0 = arith.constant 0 : index
    %c0_1 = arith.constant 0 : index
    %c0_2 = arith.constant 0 : index
    %0 = vector.load %arg1[%c0, %c0_0, %c0_1, %c0_2] : memref<1x3x16x128xf32, #tpu.memory_space<vmem>>, vector<1x1x16x128xf32>
    %1 = vector.shape_cast %0 : vector<1x1x16x128xf32> to vector<16x128xf32>
    %cst = arith.constant 1.000000e+00 : f32
    %2 = vector.broadcast %cst : f32 to vector<16x128xf32>
    %3 = arith.mulf %1, %2 : vector<16x128xf32>
    %cst_3 = arith.constant 5.000000e+01 : f32
    %4 = vector.broadcast %cst_3 : f32 to vector<16x128xf32>
    %5 = arith.addf %3, %4 : vector<16x128xf32>
    %c0_4 = arith.constant 0 : index
    %c1 = arith.constant 1 : index
    %c0_5 = arith.constant 0 : index
    %c0_6 = arith.constant 0 : index
    %6 = vector.load %arg1[%c0_4, %c1, %c0_5, %c0_6] : memref<1x3x16x128xf32, #tpu.memory_space<vmem>>, vector<1x1x16x128xf32>
    %7 = vector.shape_cast %6 : vector<1x1x16x128xf32> to vector<16x128xf32>
    %cst_7 = arith.constant 1.000000e+00 : f32
    %8 = vector.broadcast %cst_7 : f32 to vector<16x128xf32>
    %9 = arith.mulf %7, %8 : vector<16x128xf32>
    %c0_8 = arith.constant 0 : index
    %c2 = arith.constant 2 : index
    %c0_9 = arith.constant 0 : index
    %c0_10 = arith.constant 0 : index
    %10 = vector.load %arg1[%c0_8, %c2, %c0_9, %c0_10] : memref<1x3x16x128xf32, #tpu.memory_space<vmem>>, vector<1x1x16x128xf32>
    %11 = vector.shape_cast %10 : vector<1x1x16x128xf32> to vector<16x128xf32>
    %cst_11 = arith.constant 1.000000e+00 : f32
    %12 = vector.broadcast %cst_11 : f32 to vector<16x128xf32>
    %13 = arith.mulf %11, %12 : vector<16x128xf32>
    %c0_12 = arith.constant 0 : index
    %c1_13 = arith.constant 1 : index
    %c0_14 = arith.constant 0 : index
    %c0_15 = arith.constant 0 : index
    %14 = vector.load %arg2[%c0_12, %c1_13, %c0_14, %c0_15] : memref<1x3x16x128xf32, #tpu.memory_space<vmem>>, vector<1x1x16x128xf32>
    %15 = vector.shape_cast %14 : vector<1x1x16x128xf32> to vector<16x128xf32>
    %c0_16 = arith.constant 0 : index
    %c2_17 = arith.constant 2 : index
    %c0_18 = arith.constant 0 : index
    %c0_19 = arith.constant 0 : index
    %16 = vector.load %arg2[%c0_16, %c2_17, %c0_18, %c0_19] : memref<1x3x16x128xf32, #tpu.memory_space<vmem>>, vector<1x1x16x128xf32>
    %17 = vector.shape_cast %16 : vector<1x1x16x128xf32> to vector<16x128xf32>
    %18 = tpu.iota {dimensions = array<i32: 0>} : vector<16x128xi32>
    %19 = tpu.iota {dimensions = array<i32: 1>} : vector<16x128xi32>
    %c1_i32 = arith.constant 1 : i32
    %20 = tpu.dynamic_rotate %18 by %c1_i32 dim 0 : vector<16x128xi32>, i32 -> vector<16x128xi32>
    %21 = arith.subi %20, %18 : vector<16x128xi32>
    %c-1_i32 = arith.constant -1 : i32
    %22 = vector.broadcast %c-1_i32 : i32 to vector<16x128xi32>
    %23 = arith.cmpi sge, %21, %22 : vector<16x128xi32>
    %c1_i32_20 = arith.constant 1 : i32
    %24 = vector.broadcast %c1_i32_20 : i32 to vector<16x128xi32>
    %25 = arith.cmpi sle, %21, %24 : vector<16x128xi32>
    %26 = arith.andi %23, %25 : vector<16x128xi1>
    %c15_i32 = arith.constant 15 : i32
    %27 = tpu.dynamic_rotate %18 by %c15_i32 dim 0 : vector<16x128xi32>, i32 -> vector<16x128xi32>
    %28 = arith.subi %27, %18 : vector<16x128xi32>
    %c-1_i32_21 = arith.constant -1 : i32
    %29 = vector.broadcast %c-1_i32_21 : i32 to vector<16x128xi32>
    %30 = arith.cmpi sge, %28, %29 : vector<16x128xi32>
    %c1_i32_22 = arith.constant 1 : i32
    %31 = vector.broadcast %c1_i32_22 : i32 to vector<16x128xi32>
    %32 = arith.cmpi sle, %28, %31 : vector<16x128xi32>
    %33 = arith.andi %30, %32 : vector<16x128xi1>
    %c1_i32_23 = arith.constant 1 : i32
    %34 = tpu.dynamic_rotate %19 by %c1_i32_23 dim 1 : vector<16x128xi32>, i32 -> vector<16x128xi32>
    %35 = arith.subi %34, %19 : vector<16x128xi32>
    %c-1_i32_24 = arith.constant -1 : i32
    %36 = vector.broadcast %c-1_i32_24 : i32 to vector<16x128xi32>
    %37 = arith.cmpi sge, %35, %36 : vector<16x128xi32>
    %c1_i32_25 = arith.constant 1 : i32
    %38 = vector.broadcast %c1_i32_25 : i32 to vector<16x128xi32>
    %39 = arith.cmpi sle, %35, %38 : vector<16x128xi32>
    %40 = arith.andi %37, %39 : vector<16x128xi1>
    %c127_i32 = arith.constant 127 : i32
    %41 = tpu.dynamic_rotate %19 by %c127_i32 dim 1 : vector<16x128xi32>, i32 -> vector<16x128xi32>
    %42 = arith.subi %41, %19 : vector<16x128xi32>
    %c-1_i32_26 = arith.constant -1 : i32
    %43 = vector.broadcast %c-1_i32_26 : i32 to vector<16x128xi32>
    %44 = arith.cmpi sge, %42, %43 : vector<16x128xi32>
    %c1_i32_27 = arith.constant 1 : i32
    %45 = vector.broadcast %c1_i32_27 : i32 to vector<16x128xi32>
    %46 = arith.cmpi sle, %42, %45 : vector<16x128xi32>
    %47 = arith.andi %44, %46 : vector<16x128xi1>
    %48 = arith.andi %26, %40 : vector<16x128xi1>
    %49 = arith.andi %26, %47 : vector<16x128xi1>
    %50 = arith.andi %33, %40 : vector<16x128xi1>
    %51 = arith.andi %33, %47 : vector<16x128xi1>
    %52 = arith.mulf %5, %5 : vector<16x128xf32>
    %53 = arith.mulf %9, %9 : vector<16x128xf32>
    %54 = arith.addf %52, %53 : vector<16x128xf32>
    %55 = arith.mulf %13, %13 : vector<16x128xf32>
    %56 = arith.addf %54, %55 : vector<16x128xf32>
    %cst_28 = arith.constant 0.000000e+00 : f32
    %57 = vector.broadcast %cst_28 : f32 to vector<16x128xf32>
    %58 = arith.subf %57, %56 : vector<16x128xf32>
    %59 = math.exp %58 : vector<16x128xf32>
    %c1_i32_29 = arith.constant 1 : i32
    %60 = vector.broadcast %c1_i32_29 : i32 to vector<16x128xi32>
    %61 = arith.minsi %18, %60 : vector<16x128xi32>
    %c15_i32_30 = arith.constant 15 : i32
    %62 = vector.broadcast %c15_i32_30 : i32 to vector<16x128xi32>
    %63 = arith.subi %62, %18 : vector<16x128xi32>
    %c1_i32_31 = arith.constant 1 : i32
    %64 = vector.broadcast %c1_i32_31 : i32 to vector<16x128xi32>
    %65 = arith.minsi %63, %64 : vector<16x128xi32>
    %66 = arith.addi %61, %65 : vector<16x128xi32>
    %c1_i32_32 = arith.constant 1 : i32
    %67 = vector.broadcast %c1_i32_32 : i32 to vector<16x128xi32>
    %68 = arith.addi %66, %67 : vector<16x128xi32>
    %c1_i32_33 = arith.constant 1 : i32
    %69 = vector.broadcast %c1_i32_33 : i32 to vector<16x128xi32>
    %70 = arith.minsi %19, %69 : vector<16x128xi32>
    %c127_i32_34 = arith.constant 127 : i32
    %71 = vector.broadcast %c127_i32_34 : i32 to vector<16x128xi32>
    %72 = arith.subi %71, %19 : vector<16x128xi32>
    %c1_i32_35 = arith.constant 1 : i32
    %73 = vector.broadcast %c1_i32_35 : i32 to vector<16x128xi32>
    %74 = arith.minsi %72, %73 : vector<16x128xi32>
    %75 = arith.addi %70, %74 : vector<16x128xi32>
    %c1_i32_36 = arith.constant 1 : i32
    %76 = vector.broadcast %c1_i32_36 : i32 to vector<16x128xi32>
    %77 = arith.addi %75, %76 : vector<16x128xi32>
    %78 = arith.muli %68, %77 : vector<16x128xi32>
    %c9_i32 = arith.constant 9 : i32
    %79 = vector.broadcast %c9_i32 : i32 to vector<16x128xi32>
    %80 = arith.subi %79, %78 : vector<16x128xi32>
    %81 = arith.sitofp %80 : vector<16x128xi32> to vector<16x128xf32>
    %82 = arith.mulf %81, %59 : vector<16x128xf32>
    %cst_37 = arith.constant 1.000000e+00 : f32
    %83 = vector.broadcast %cst_37 : f32 to vector<16x128xf32>
    %84 = arith.addf %83, %82 : vector<16x128xf32>
    %c1_i32_38 = arith.constant 1 : i32
    %85 = tpu.dynamic_rotate %5 by %c1_i32_38 dim 0 : vector<16x128xf32>, i32 -> vector<16x128xf32>
    %c1_i32_39 = arith.constant 1 : i32
    %86 = tpu.dynamic_rotate %9 by %c1_i32_39 dim 0 : vector<16x128xf32>, i32 -> vector<16x128xf32>
    %c1_i32_40 = arith.constant 1 : i32
    %87 = tpu.dynamic_rotate %13 by %c1_i32_40 dim 0 : vector<16x128xf32>, i32 -> vector<16x128xf32>
    %c1_i32_41 = arith.constant 1 : i32
    %88 = tpu.dynamic_rotate %15 by %c1_i32_41 dim 0 : vector<16x128xf32>, i32 -> vector<16x128xf32>
    %c1_i32_42 = arith.constant 1 : i32
    %89 = tpu.dynamic_rotate %17 by %c1_i32_42 dim 0 : vector<16x128xf32>, i32 -> vector<16x128xf32>
    %c1_i32_43 = arith.constant 1 : i32
    %90 = tpu.dynamic_rotate %85 by %c1_i32_43 dim 1 : vector<16x128xf32>, i32 -> vector<16x128xf32>
    %c1_i32_44 = arith.constant 1 : i32
    %91 = tpu.dynamic_rotate %86 by %c1_i32_44 dim 1 : vector<16x128xf32>, i32 -> vector<16x128xf32>
    %c1_i32_45 = arith.constant 1 : i32
    %92 = tpu.dynamic_rotate %87 by %c1_i32_45 dim 1 : vector<16x128xf32>, i32 -> vector<16x128xf32>
    %c1_i32_46 = arith.constant 1 : i32
    %93 = tpu.dynamic_rotate %88 by %c1_i32_46 dim 1 : vector<16x128xf32>, i32 -> vector<16x128xf32>
    %c1_i32_47 = arith.constant 1 : i32
    %94 = tpu.dynamic_rotate %89 by %c1_i32_47 dim 1 : vector<16x128xf32>, i32 -> vector<16x128xf32>
    %95 = arith.subf %90, %5 : vector<16x128xf32>
    %96 = arith.subf %91, %9 : vector<16x128xf32>
    %97 = arith.subf %92, %13 : vector<16x128xf32>
    %98 = arith.mulf %95, %95 : vector<16x128xf32>
    %99 = arith.mulf %96, %96 : vector<16x128xf32>
    %100 = arith.addf %98, %99 : vector<16x128xf32>
    %101 = arith.mulf %97, %97 : vector<16x128xf32>
    %102 = arith.addf %100, %101 : vector<16x128xf32>
    %cst_48 = arith.constant 0.000000e+00 : f32
    %103 = vector.broadcast %cst_48 : f32 to vector<16x128xf32>
    %104 = arith.subf %103, %102 : vector<16x128xf32>
    %105 = math.exp %104 : vector<16x128xf32>
    %cst_49 = arith.constant 0.000000e+00 : f32
    %106 = vector.broadcast %cst_49 : f32 to vector<16x128xf32>
    %107 = arith.select %48, %105, %106 : vector<16x128xi1>, vector<16x128xf32>
    %108 = arith.addf %84, %107 : vector<16x128xf32>
    %109 = arith.mulf %107, %93 : vector<16x128xf32>
    %110 = arith.addf %15, %109 : vector<16x128xf32>
    %111 = arith.mulf %107, %94 : vector<16x128xf32>
    %112 = arith.addf %17, %111 : vector<16x128xf32>
    %113 = arith.subf %85, %5 : vector<16x128xf32>
    %114 = arith.subf %86, %9 : vector<16x128xf32>
    %115 = arith.subf %87, %13 : vector<16x128xf32>
    %116 = arith.mulf %113, %113 : vector<16x128xf32>
    %117 = arith.mulf %114, %114 : vector<16x128xf32>
    %118 = arith.addf %116, %117 : vector<16x128xf32>
    %119 = arith.mulf %115, %115 : vector<16x128xf32>
    %120 = arith.addf %118, %119 : vector<16x128xf32>
    %cst_50 = arith.constant 0.000000e+00 : f32
    %121 = vector.broadcast %cst_50 : f32 to vector<16x128xf32>
    %122 = arith.subf %121, %120 : vector<16x128xf32>
    %123 = math.exp %122 : vector<16x128xf32>
    %cst_51 = arith.constant 0.000000e+00 : f32
    %124 = vector.broadcast %cst_51 : f32 to vector<16x128xf32>
    %125 = arith.select %26, %123, %124 : vector<16x128xi1>, vector<16x128xf32>
    %126 = arith.addf %108, %125 : vector<16x128xf32>
    %127 = arith.mulf %125, %88 : vector<16x128xf32>
    %128 = arith.addf %110, %127 : vector<16x128xf32>
    %129 = arith.mulf %125, %89 : vector<16x128xf32>
    %130 = arith.addf %112, %129 : vector<16x128xf32>
    %c127_i32_52 = arith.constant 127 : i32
    %131 = tpu.dynamic_rotate %85 by %c127_i32_52 dim 1 : vector<16x128xf32>, i32 -> vector<16x128xf32>
    %c127_i32_53 = arith.constant 127 : i32
    %132 = tpu.dynamic_rotate %86 by %c127_i32_53 dim 1 : vector<16x128xf32>, i32 -> vector<16x128xf32>
    %c127_i32_54 = arith.constant 127 : i32
    %133 = tpu.dynamic_rotate %87 by %c127_i32_54 dim 1 : vector<16x128xf32>, i32 -> vector<16x128xf32>
    %c127_i32_55 = arith.constant 127 : i32
    %134 = tpu.dynamic_rotate %88 by %c127_i32_55 dim 1 : vector<16x128xf32>, i32 -> vector<16x128xf32>
    %c127_i32_56 = arith.constant 127 : i32
    %135 = tpu.dynamic_rotate %89 by %c127_i32_56 dim 1 : vector<16x128xf32>, i32 -> vector<16x128xf32>
    %136 = arith.subf %131, %5 : vector<16x128xf32>
    %137 = arith.subf %132, %9 : vector<16x128xf32>
    %138 = arith.subf %133, %13 : vector<16x128xf32>
    %139 = arith.mulf %136, %136 : vector<16x128xf32>
    %140 = arith.mulf %137, %137 : vector<16x128xf32>
    %141 = arith.addf %139, %140 : vector<16x128xf32>
    %142 = arith.mulf %138, %138 : vector<16x128xf32>
    %143 = arith.addf %141, %142 : vector<16x128xf32>
    %cst_57 = arith.constant 0.000000e+00 : f32
    %144 = vector.broadcast %cst_57 : f32 to vector<16x128xf32>
    %145 = arith.subf %144, %143 : vector<16x128xf32>
    %146 = math.exp %145 : vector<16x128xf32>
    %cst_58 = arith.constant 0.000000e+00 : f32
    %147 = vector.broadcast %cst_58 : f32 to vector<16x128xf32>
    %148 = arith.select %49, %146, %147 : vector<16x128xi1>, vector<16x128xf32>
    %149 = arith.addf %126, %148 : vector<16x128xf32>
    %150 = arith.mulf %148, %134 : vector<16x128xf32>
    %151 = arith.addf %128, %150 : vector<16x128xf32>
    %152 = arith.mulf %148, %135 : vector<16x128xf32>
    %153 = arith.addf %130, %152 : vector<16x128xf32>
    %c1_i32_59 = arith.constant 1 : i32
    %154 = tpu.dynamic_rotate %5 by %c1_i32_59 dim 1 : vector<16x128xf32>, i32 -> vector<16x128xf32>
    %c1_i32_60 = arith.constant 1 : i32
    %155 = tpu.dynamic_rotate %9 by %c1_i32_60 dim 1 : vector<16x128xf32>, i32 -> vector<16x128xf32>
    %c1_i32_61 = arith.constant 1 : i32
    %156 = tpu.dynamic_rotate %13 by %c1_i32_61 dim 1 : vector<16x128xf32>, i32 -> vector<16x128xf32>
    %c1_i32_62 = arith.constant 1 : i32
    %157 = tpu.dynamic_rotate %15 by %c1_i32_62 dim 1 : vector<16x128xf32>, i32 -> vector<16x128xf32>
    %c1_i32_63 = arith.constant 1 : i32
    %158 = tpu.dynamic_rotate %17 by %c1_i32_63 dim 1 : vector<16x128xf32>, i32 -> vector<16x128xf32>
    %159 = arith.subf %154, %5 : vector<16x128xf32>
    %160 = arith.subf %155, %9 : vector<16x128xf32>
    %161 = arith.subf %156, %13 : vector<16x128xf32>
    %162 = arith.mulf %159, %159 : vector<16x128xf32>
    %163 = arith.mulf %160, %160 : vector<16x128xf32>
    %164 = arith.addf %162, %163 : vector<16x128xf32>
    %165 = arith.mulf %161, %161 : vector<16x128xf32>
    %166 = arith.addf %164, %165 : vector<16x128xf32>
    %cst_64 = arith.constant 0.000000e+00 : f32
    %167 = vector.broadcast %cst_64 : f32 to vector<16x128xf32>
    %168 = arith.subf %167, %166 : vector<16x128xf32>
    %169 = math.exp %168 : vector<16x128xf32>
    %cst_65 = arith.constant 0.000000e+00 : f32
    %170 = vector.broadcast %cst_65 : f32 to vector<16x128xf32>
    %171 = arith.select %40, %169, %170 : vector<16x128xi1>, vector<16x128xf32>
    %172 = arith.addf %149, %171 : vector<16x128xf32>
    %173 = arith.mulf %171, %157 : vector<16x128xf32>
    %174 = arith.addf %151, %173 : vector<16x128xf32>
    %175 = arith.mulf %171, %158 : vector<16x128xf32>
    %176 = arith.addf %153, %175 : vector<16x128xf32>
    %c127_i32_66 = arith.constant 127 : i32
    %177 = tpu.dynamic_rotate %5 by %c127_i32_66 dim 1 : vector<16x128xf32>, i32 -> vector<16x128xf32>
    %c127_i32_67 = arith.constant 127 : i32
    %178 = tpu.dynamic_rotate %9 by %c127_i32_67 dim 1 : vector<16x128xf32>, i32 -> vector<16x128xf32>
    %c127_i32_68 = arith.constant 127 : i32
    %179 = tpu.dynamic_rotate %13 by %c127_i32_68 dim 1 : vector<16x128xf32>, i32 -> vector<16x128xf32>
    %c127_i32_69 = arith.constant 127 : i32
    %180 = tpu.dynamic_rotate %15 by %c127_i32_69 dim 1 : vector<16x128xf32>, i32 -> vector<16x128xf32>
    %c127_i32_70 = arith.constant 127 : i32
    %181 = tpu.dynamic_rotate %17 by %c127_i32_70 dim 1 : vector<16x128xf32>, i32 -> vector<16x128xf32>
    %182 = arith.subf %177, %5 : vector<16x128xf32>
    %183 = arith.subf %178, %9 : vector<16x128xf32>
    %184 = arith.subf %179, %13 : vector<16x128xf32>
    %185 = arith.mulf %182, %182 : vector<16x128xf32>
    %186 = arith.mulf %183, %183 : vector<16x128xf32>
    %187 = arith.addf %185, %186 : vector<16x128xf32>
    %188 = arith.mulf %184, %184 : vector<16x128xf32>
    %189 = arith.addf %187, %188 : vector<16x128xf32>
    %cst_71 = arith.constant 0.000000e+00 : f32
    %190 = vector.broadcast %cst_71 : f32 to vector<16x128xf32>
    %191 = arith.subf %190, %189 : vector<16x128xf32>
    %192 = math.exp %191 : vector<16x128xf32>
    %cst_72 = arith.constant 0.000000e+00 : f32
    %193 = vector.broadcast %cst_72 : f32 to vector<16x128xf32>
    %194 = arith.select %47, %192, %193 : vector<16x128xi1>, vector<16x128xf32>
    %195 = arith.addf %172, %194 : vector<16x128xf32>
    %196 = arith.mulf %194, %180 : vector<16x128xf32>
    %197 = arith.addf %174, %196 : vector<16x128xf32>
    %198 = arith.mulf %194, %181 : vector<16x128xf32>
    %199 = arith.addf %176, %198 : vector<16x128xf32>
    %c15_i32_73 = arith.constant 15 : i32
    %200 = tpu.dynamic_rotate %5 by %c15_i32_73 dim 0 : vector<16x128xf32>, i32 -> vector<16x128xf32>
    %c15_i32_74 = arith.constant 15 : i32
    %201 = tpu.dynamic_rotate %9 by %c15_i32_74 dim 0 : vector<16x128xf32>, i32 -> vector<16x128xf32>
    %c15_i32_75 = arith.constant 15 : i32
    %202 = tpu.dynamic_rotate %13 by %c15_i32_75 dim 0 : vector<16x128xf32>, i32 -> vector<16x128xf32>
    %c15_i32_76 = arith.constant 15 : i32
    %203 = tpu.dynamic_rotate %15 by %c15_i32_76 dim 0 : vector<16x128xf32>, i32 -> vector<16x128xf32>
    %c15_i32_77 = arith.constant 15 : i32
    %204 = tpu.dynamic_rotate %17 by %c15_i32_77 dim 0 : vector<16x128xf32>, i32 -> vector<16x128xf32>
    %c1_i32_78 = arith.constant 1 : i32
    %205 = tpu.dynamic_rotate %200 by %c1_i32_78 dim 1 : vector<16x128xf32>, i32 -> vector<16x128xf32>
    %c1_i32_79 = arith.constant 1 : i32
    %206 = tpu.dynamic_rotate %201 by %c1_i32_79 dim 1 : vector<16x128xf32>, i32 -> vector<16x128xf32>
    %c1_i32_80 = arith.constant 1 : i32
    %207 = tpu.dynamic_rotate %202 by %c1_i32_80 dim 1 : vector<16x128xf32>, i32 -> vector<16x128xf32>
    %c1_i32_81 = arith.constant 1 : i32
    %208 = tpu.dynamic_rotate %203 by %c1_i32_81 dim 1 : vector<16x128xf32>, i32 -> vector<16x128xf32>
    %c1_i32_82 = arith.constant 1 : i32
    %209 = tpu.dynamic_rotate %204 by %c1_i32_82 dim 1 : vector<16x128xf32>, i32 -> vector<16x128xf32>
    %210 = arith.subf %205, %5 : vector<16x128xf32>
    %211 = arith.subf %206, %9 : vector<16x128xf32>
    %212 = arith.subf %207, %13 : vector<16x128xf32>
    %213 = arith.mulf %210, %210 : vector<16x128xf32>
    %214 = arith.mulf %211, %211 : vector<16x128xf32>
    %215 = arith.addf %213, %214 : vector<16x128xf32>
    %216 = arith.mulf %212, %212 : vector<16x128xf32>
    %217 = arith.addf %215, %216 : vector<16x128xf32>
    %cst_83 = arith.constant 0.000000e+00 : f32
    %218 = vector.broadcast %cst_83 : f32 to vector<16x128xf32>
    %219 = arith.subf %218, %217 : vector<16x128xf32>
    %220 = math.exp %219 : vector<16x128xf32>
    %cst_84 = arith.constant 0.000000e+00 : f32
    %221 = vector.broadcast %cst_84 : f32 to vector<16x128xf32>
    %222 = arith.select %50, %220, %221 : vector<16x128xi1>, vector<16x128xf32>
    %223 = arith.addf %195, %222 : vector<16x128xf32>
    %224 = arith.mulf %222, %208 : vector<16x128xf32>
    %225 = arith.addf %197, %224 : vector<16x128xf32>
    %226 = arith.mulf %222, %209 : vector<16x128xf32>
    %227 = arith.addf %199, %226 : vector<16x128xf32>
    %228 = arith.subf %200, %5 : vector<16x128xf32>
    %229 = arith.subf %201, %9 : vector<16x128xf32>
    %230 = arith.subf %202, %13 : vector<16x128xf32>
    %231 = arith.mulf %228, %228 : vector<16x128xf32>
    %232 = arith.mulf %229, %229 : vector<16x128xf32>
    %233 = arith.addf %231, %232 : vector<16x128xf32>
    %234 = arith.mulf %230, %230 : vector<16x128xf32>
    %235 = arith.addf %233, %234 : vector<16x128xf32>
    %cst_85 = arith.constant 0.000000e+00 : f32
    %236 = vector.broadcast %cst_85 : f32 to vector<16x128xf32>
    %237 = arith.subf %236, %235 : vector<16x128xf32>
    %238 = math.exp %237 : vector<16x128xf32>
    %cst_86 = arith.constant 0.000000e+00 : f32
    %239 = vector.broadcast %cst_86 : f32 to vector<16x128xf32>
    %240 = arith.select %33, %238, %239 : vector<16x128xi1>, vector<16x128xf32>
    %241 = arith.addf %223, %240 : vector<16x128xf32>
    %242 = arith.mulf %240, %203 : vector<16x128xf32>
    %243 = arith.addf %225, %242 : vector<16x128xf32>
    %244 = arith.mulf %240, %204 : vector<16x128xf32>
    %245 = arith.addf %227, %244 : vector<16x128xf32>
    %c127_i32_87 = arith.constant 127 : i32
    %246 = tpu.dynamic_rotate %200 by %c127_i32_87 dim 1 : vector<16x128xf32>, i32 -> vector<16x128xf32>
    %c127_i32_88 = arith.constant 127 : i32
    %247 = tpu.dynamic_rotate %201 by %c127_i32_88 dim 1 : vector<16x128xf32>, i32 -> vector<16x128xf32>
    %c127_i32_89 = arith.constant 127 : i32
    %248 = tpu.dynamic_rotate %202 by %c127_i32_89 dim 1 : vector<16x128xf32>, i32 -> vector<16x128xf32>
    %c127_i32_90 = arith.constant 127 : i32
    %249 = tpu.dynamic_rotate %203 by %c127_i32_90 dim 1 : vector<16x128xf32>, i32 -> vector<16x128xf32>
    %c127_i32_91 = arith.constant 127 : i32
    %250 = tpu.dynamic_rotate %204 by %c127_i32_91 dim 1 : vector<16x128xf32>, i32 -> vector<16x128xf32>
    %251 = arith.subf %246, %5 : vector<16x128xf32>
    %252 = arith.subf %247, %9 : vector<16x128xf32>
    %253 = arith.subf %248, %13 : vector<16x128xf32>
    %254 = arith.mulf %251, %251 : vector<16x128xf32>
    %255 = arith.mulf %252, %252 : vector<16x128xf32>
    %256 = arith.addf %254, %255 : vector<16x128xf32>
    %257 = arith.mulf %253, %253 : vector<16x128xf32>
    %258 = arith.addf %256, %257 : vector<16x128xf32>
    %cst_92 = arith.constant 0.000000e+00 : f32
    %259 = vector.broadcast %cst_92 : f32 to vector<16x128xf32>
    %260 = arith.subf %259, %258 : vector<16x128xf32>
    %261 = math.exp %260 : vector<16x128xf32>
    %cst_93 = arith.constant 0.000000e+00 : f32
    %262 = vector.broadcast %cst_93 : f32 to vector<16x128xf32>
    %263 = arith.select %51, %261, %262 : vector<16x128xi1>, vector<16x128xf32>
    %264 = arith.addf %241, %263 : vector<16x128xf32>
    %265 = arith.mulf %263, %249 : vector<16x128xf32>
    %266 = arith.addf %243, %265 : vector<16x128xf32>
    %267 = arith.mulf %263, %250 : vector<16x128xf32>
    %268 = arith.addf %245, %267 : vector<16x128xf32>
    %cst_94 = arith.constant 1.000000e+00 : f32
    %269 = vector.broadcast %cst_94 : f32 to vector<16x128xf32>
    %270 = arith.divf %269, %264 : vector<16x128xf32>
    %271 = arith.mulf %266, %270 : vector<16x128xf32>
    %c0_95 = arith.constant 0 : index
    %c0_96 = arith.constant 0 : index
    %c0_97 = arith.constant 0 : index
    %c0_98 = arith.constant 0 : index
    %272 = vector.load %arg3[%c0_95, %c0_96, %c0_97, %c0_98] : memref<1x2x16x128xf32, #tpu.memory_space<vmem>>, vector<1x1x16x128xf32>
    %273 = vector.shape_cast %272 : vector<1x1x16x128xf32> to vector<16x128xf32>
    %274 = vector.shape_cast %271 : vector<16x128xf32> to vector<1x1x16x128xf32>
    tpu.vector_store %arg3[%c0_95, %c0_96, %c0_97, %c0_98], %274 {strides = array<i32>} : memref<1x2x16x128xf32, #tpu.memory_space<vmem>>, vector<1x1x16x128xf32>,
    %275 = arith.mulf %268, %270 : vector<16x128xf32>
    %c0_99 = arith.constant 0 : index
    %c1_100 = arith.constant 1 : index
    %c0_101 = arith.constant 0 : index
    %c0_102 = arith.constant 0 : index
    %276 = vector.load %arg3[%c0_99, %c1_100, %c0_101, %c0_102] : memref<1x2x16x128xf32, #tpu.memory_space<vmem>>, vector<1x1x16x128xf32>
    %277 = vector.shape_cast %276 : vector<1x1x16x128xf32> to vector<16x128xf32>
    %278 = vector.shape_cast %275 : vector<16x128xf32> to vector<1x1x16x128xf32>
    tpu.vector_store %arg3[%c0_99, %c1_100, %c0_101, %c0_102], %278 {strides = array<i32>} : memref<1x2x16x128xf32, #tpu.memory_space<vmem>>, vector<1x1x16x128xf32>,
    return
  }
  func.func @transform_0(%arg0: i32) -> (i32, i32, i32, i32) {
    %c0_i32 = arith.constant 0 : i32
    %c0_i32_0 = arith.constant 0 : i32
    %c0_i32_1 = arith.constant 0 : i32
    %c0_i32_2 = arith.constant 0 : i32
    return %arg0, %c0_i32, %c0_i32_0, %c0_i32_1 : i32, i32, i32, i32
  }
  func.func @transform_1(%arg0: i32) -> (i32, i32, i32, i32) {
    %c0_i32 = arith.constant 0 : i32
    %c0_i32_0 = arith.constant 0 : i32
    %c0_i32_1 = arith.constant 0 : i32
    %c0_i32_2 = arith.constant 0 : i32
    return %arg0, %c0_i32, %c0_i32_0, %c0_i32_1 : i32, i32, i32, i32
  }
  func.func @transform_2(%arg0: i32) -> (i32, i32, i32, i32) {
    %c0_i32 = arith.constant 0 : i32
    %c0_i32_0 = arith.constant 0 : i32
    %c0_i32_1 = arith.constant 0 : i32
    %c0_i32_2 = arith.constant 0 : i32
    return %arg0, %c0_i32, %c0_i32_0, %c0_i32_1 : i32, i32, i32, i32
  }
}

</mosaic_0001>

<bundles_post_ra>
// kernel: weighted_average_color.1
= control target key start
LH: loop header
LB: loop body
LE: loop exit
PB: predicated region body
PF: predicated region fallthrough
CT: control target
= control target key end

     0   :  { %7 = vsyncpa [#allocation3], 0  ;;  %s1910_s0 = inlined_call_operand.hbm [shape: f32[2,3,16,128], index: 0, kind: input, shape index: {}]   ;;  %s1911_s1 = inlined_call_operand.hbm [shape: f32[2,3,16,128], index: 1, kind: input, shape index: {}]   ;;  %s1912_s2 = inlined_call_operand.hbm [shape: f32[2,2,16,128], index: 2, kind: output, shape index: {}]  }
   0x1   :  { %9 = vsyncpa [#allocation3 + $0x1], 0 }
   0x2   :  { %10 = vsyncpa [#allocation6], 0 }
   0x3   :  { %12 = vsyncpa [#allocation6 + $0x1], 0 }
   0x4   :  { %13 = vsyncpa [#allocation4], 0 }
   0x5   :  { %15 = vsyncpa [#allocation4 + $0x1], 0  ;;  %s1152_s9 = smov 0   ;;  %s1154_s10 = smov 0  }
   0x6   :  { %s1156_s11 = smov 0   ;;  %s1158_s12 = smov 0  }
   0x7 LB: > { %s1173_s13 = sadd.s32 4294967295, %s1126_s12   ;;  %s871_s14 = sadd.s32 4294967294, %s1126_s12   ;;  %s1126_s12 = sphi %s1158_s12, %s1939_s12   ;;  %s1122_s11 = sphi %s1156_s11, %s1938_s11   ;;  %s1118_s10 = sphi %s1154_s10, %s1937_s10   ;;  %s1114_s9 = sphi %s1152_s9, %s1936_s9  }
   0x8   : > { %s1177_s15 = sadd.s32 1, %s1126_s12   ;;  %s28_s16 = sadd.s32 1, %s1122_s11 }
   0x9   : > { %s25_s17 = ssub.s32 %s1126_s12, %s1177_s15  ;;  %p35_p0 = scmp.ne.s32.totalorder %s1122_s11, %s1118_s10 }
   0xa   : > { %p26_p1 = scmp.eq.s32.totalorder %s25_s17, 0  ;;  %p36_p2 = scmp.eq.s32.totalorder %s1126_s12, 0 }
   0xb   : > { %p41_p3 = scmp.ne.s32.totalorder %s1118_s10, %s1114_s9  ;;  %p42_p4 = scmp.eq.s32.totalorder %s1173_s13, 0 }
   0xc   : > { %s1189_s18 = scalar_select %p26_p1, %s1122_s11, %s28_s16  }
   0xd   : > { %p37_p5 = por %p36_p2, %p35_p0  ;;  %p1191_p6 = por %p42_p4, %p41_p3 }
   0xe   : > { %p91_p7 = scmp.eq.s32.totalorder %s1173_s13, 1  ;;  %p97_p8 = scmp.eq.s32.totalorder %s871_s14, 1 }
   0xf   : > { %s1915_s19 = scalar_select %p1191_p6, 1, 0 }
  0x10   : > { %p916_p10 = scmp.lt.s32.totalorder %s1126_s12, 2  ;;  %p1198_p11 = por %p91_p7, %p35_p0 }
  0x11   : > { %p1202_p12 = por %p97_p8, %p41_p3  ;;  %s1207_s22 = sand.u32 1, %s1122_s11  }
  0x12   : > { %s1916_s20 = scalar_select %p1198_p11, 1, 0 }
  0x13   : > { %s1917_s21 = scalar_select %p1202_p12, 1, 0 }
  0x14   : > { %s895_s23 = smul.u32 768, %s1126_s12  ;;  %p1218_p13 = pnand %p916_p10, %p37_p5 }
  0x15   : > { %s894_s24 = smul.u32 48, %s1207_s22  ;;  %s118_s3 = scalar_lea.sflag [#allocation3], %s1207_s22 }
  0x16   : > { %s1216_s27 = scalar_lea.hbm %s1910_s0, %s895_s23  ;;  %p998_p1 = pneg %p1218_p13 }
  0x17   : > { %s121_s29 = scalar_lea.vmem [#allocation2], %s894_s24  ;;  %s996_s4 = scalar_lea.hbm %s1216_s27, 768 }
  0x18   : > { %s128_s30 = sshll.u32 %s121_s29, 4  ;;  %p997_p0 = scmp.ne.s32.totalorder %s1216_s27, %s996_s4  ;;  %s1224_s30 = int_to_ptr.vmem [resolvable:$true] %s128_s30 }
  0x19   : > { %s1001_s7 = scalar_lea.hbm %s1910_s0, 1536  ;;  %p1002_p4 = scmp.lt.u32.totalorder %s1216_s27, %s1910_s0 }
  0x1a   : > { %p999_p2 = pnand %p998_p1, %p997_p0  ;;  %p1003_p5 = scmp.lt.u32.totalorder %s1001_s7, %s996_s4 }
  0x1b   : > { %p1005_p8 = scmp.lt.u32.totalorder %s996_s4, %s1216_s27 }
  0x1c   : > { %p1000_p3 = pneg %p999_p2  ;;  %p1004_p7 = por %p1003_p5, %p1002_p4 }
  0x1e   : > { %p1006_p10 = por %p1005_p8, %p1004_p7 }
  0x20   : > { %p1007_p9 = pnand %p1006_p10, %p1000_p3 }
  0x22   : > { %1010 = shalt.err (!%p1007_p9)
}
  0x23   : > { %s1011_s16 = scalar_lea.vmem %s1224_s30, 768  ;;  %s1128_s17 = smov [#allocation2]  }
  0x24   : > { %p1012_p0 = scmp.ne.s32.totalorder %s1224_s30, %s1011_s16  ;;  %s1016_s25 = sshll.u32 %s1128_s17, 4  ;;  %s1017_s25 = int_to_ptr.vmem [resolvable:$false] %s1016_s25 }
  0x25   : > { %s1018_s26 = scalar_lea.vmem %s1017_s25, 1536  ;;  %p1019_p11 = scmp.lt.s32.totalorder %s1224_s30, %s1017_s25 }
  0x26   : > { %p1014_p2 = pnand %p1012_p0, %p998_p1  ;;  %p1020_p4 = scmp.lt.s32.totalorder %s1018_s26, %s1011_s16 }
  0x28   : > { %p1015_p12 = pneg %p1014_p2  ;;  %p1021_p5 = por %p1020_p4, %p1019_p11 }
  0x2a   : > { %p1022_p7 = pnand %p1021_p5, %p1015_p12 }
  0x2c   : > { %1025 = shalt.err (!%p1022_p7)
}
  0x2d   : > { %s1129_s29 = smov 128   ;;  %s1130_s4 = smov 8  }
  0x2e   : > { %908 = dma.hbm_to_vmem [thread:$0]  (!%p1218_p13), %s1216_s27, 768, %s1224_s30, %s118_s3, %s1129_s29, %s1129_s29, %s1130_s4  }
  0x2f   : > { %p876_p9 = scmp.ge.s32.totalorder %s1126_s12, 1  ;;  %p157_p11 = scmp.lt.s32.totalorder %s1126_s12, 3 }
  0x30   : > { %s1268_s8 = scalar_lea.hbm %s1911_s1, %s895_s23  ;;  %s142_s14 = scalar_lea.vmem [#allocation5], %s894_s24 }
  0x31   : > { %p1259_p12 = pnand %p876_p9, %p157_p11  ;;  %s149_s16 = sshll.u32 %s142_s14, 4  ;;  %s1272_s16 = int_to_ptr.vmem [resolvable:$true] %s149_s16 }
  0x32   : > { %s139_s27 = scalar_lea.sflag [#allocation6], %s1207_s22  ;;  %s1026_s30 = scalar_lea.hbm %s1268_s8, 768 }
  0x33   : > { %p1027_p3 = scmp.ne.s32.totalorder %s1268_s8, %s1026_s30  ;;  %s1031_s23 = scalar_lea.hbm %s1911_s1, 1536 }
  0x34   : > { %p1032_p0 = scmp.lt.u32.totalorder %s1268_s8, %s1911_s1  ;;  %p1033_p2 = scmp.lt.u32.totalorder %s1031_s23, %s1026_s30 }
  0x35   : > { %p1029_p8 = pnand %p1027_p3, %p998_p1  ;;  %p1035_p5 = scmp.lt.u32.totalorder %s1026_s30, %s1268_s8 }
  0x36   : > { %p1034_p4 = por %p1033_p2, %p1032_p0 }
  0x37   : > { %p1030_p10 = pneg %p1029_p8 }
  0x38   : > { %p1036_p7 = por %p1035_p5, %p1034_p4 }
  0x3a   : > { %p1037_p9 = pnand %p1036_p7, %p1030_p10 }
  0x3c   : > { %1040 = shalt.err (!%p1037_p9)
}
  0x3d   : > { %s1041_s24 = scalar_lea.vmem %s1272_s16, 768  ;;  %s1131_s6 = smov [#allocation5]  }
  0x3e   : > { %p1042_p11 = scmp.ne.s32.totalorder %s1272_s16, %s1041_s24  ;;  %s1046_s7 = sshll.u32 %s1131_s6, 4  ;;  %s1047_s7 = int_to_ptr.vmem [resolvable:$false] %s1046_s7 }
  0x3f   : > { %s1048_s14 = scalar_lea.vmem %s1047_s7, 1536  ;;  %p1049_p6 = scmp.lt.s32.totalorder %s1272_s16, %s1047_s7 }
  0x40   : > { %p1044_p3 = pnand %p1042_p11, %p998_p1  ;;  %p1050_p0 = scmp.lt.s32.totalorder %s1048_s14, %s1041_s24 }
  0x42   : > { %p1045_p8 = pneg %p1044_p3  ;;  %p1051_p2 = por %p1050_p0, %p1049_p6 }
  0x44   : > { %p1052_p4 = pnand %p1051_p2, %p1045_p8 }
  0x46   : > { %1055 = shalt.err (!%p1052_p4)
}
  0x47   : > { %911 = dma.hbm_to_vmem [thread:$0]  (!%p1218_p13), %s1268_s8, 768, %s1272_s16, %s139_s27, %s1129_s29, %s1129_s29, %s1130_s4  }
  0x48   : > { %161 = sbr.rel (%p1259_p12) target bundleno = 344 (0x158), region = 28  ;;  %s1306_s30 = sand.u32 (!%p1259_p12), 1, %s1118_s10  }
  0x49   : > { %s898_s3 = smul.u32 (!%p1259_p12), 48, %s1306_s30  ;;  %s164_s17 = scalar_lea.sflag (!%p1259_p12), [#allocation3], %s1306_s30 }
  0x4a   : > { %p1920_p6 = scmp.ne.s32.totalorder (!%p1259_p12), %s1915_s19, 0 }
  0x4b   : > { %s167_s28 = scalar_lea.vmem (!%p1259_p12), [#allocation2], %s898_s3 }
  0x4f   : > { %1101 = dma.done.wait (%p1920_p6), %s164_s17, 768  }
  0x50   : > { %1103 = vsyncadd (%p1920_p6), %s164_s17, 4294966528  ;;  %s173_s22 = scalar_lea.sflag [#allocation6], %s1306_s30  ;;  %s1315_s29 = scalar_lea.vmem [#allocation5], %s898_s3 }
  0x51   : > { %1105 = dma.done.wait (%p1920_p6), %s173_s22, 768  }
  0x52   : > { %1107 = vsyncadd (%p1920_p6), %s173_s22, 4294966528  ;;  %v218_v0 = vlaneseq  ;;  %s1132_s4 = smov 1   ;;  %v1332_v6 = vld [vmem:[%s167_s28 + $0x10] sm:$0xff]  ;;  %v1334_v7 = vld [vmem:[%s167_s28 + $0x18] sm:$0xff]  ;;  %s1133_s19 = smov 127  }
  0x53   : > { %v1337_v8 = vld [vmem:[%s167_s28 + $0x20] sm:$0xff]  ;;  %v320_v9 = vrot.slane %v1332_v6, 7  ;;  %v321_v10 = vrot.slane %v1334_v7, 7  ;;  %v1344_v11 = vld [vmem:[%s167_s28 + $0x28] sm:$0xff]  ;;  %v590_v19 = vrot.slane %v1332_v6, 1  ;;  %v591_v22 = vrot.slane %v1334_v7, 1 }
  0x54   : > { %v1321_v1 = vand.u32 127, %v218_v0  ;;  %v1323_v2 = vshrl.u32 %v218_v0, 7  ;;  %v324_v12 = vrot.slane %v1337_v8, 7  ;;  %v202_v13 = vld [vmem:[%s167_s28] sm:$0xff]  ;;  %v203_v14 = vld [vmem:[%s167_s28 + $0x8] sm:$0xff]  ;;  %v325_v16 = vrot.slane %v1344_v11, 7 }
  0x55   : > { %v1354_v17 = vadd.f32 50.0, %v202_v13  ;;  %v1356_v18 = vadd.f32 50.0, %v203_v14  ;;  %v594_v23 = vrot.slane %v1337_v8, 1  ;;  %v595_v47 = vrot.slane %v1344_v11, 1  ;;  %s877_s5 = sshll.u32 %s1306_s30, 5  ;;  %s893_s27 = sshll.u32 %s1173_s13, 9 }
  0x56   : > { %249 = vrot.lane.b32.xlu0 %v1321_v1, %s1132_s4  ;;  %v1328_v3 = vadd.s32 8, %v1323_v2  ;;  %v223_v4 = vrot.slane %v1323_v2, 7  ;;  %vm225_vm0 = vcmp.lt.s32.totalorder %v1323_v2, 1  ;;  %vm238_vm1 = vcmp.lt.s32.totalorder %v1323_v2, 7  ;;  %s201_s8 = scalar_lea.vmem [#allocation7], %s877_s5  ;;  %s1866_s26 = scalar_lea.hbm %s1912_s2, %s893_s27 }
  0x57   : > { %v1361_v20 = vsel %vm225_vm0, %v320_v9, %v321_v10  ;;  %v323_v21 = vsel %vm225_vm0, %v321_v10, %v320_v9  ;;  %v1374_v26 = vsel %vm225_vm0, %v324_v12, %v325_v16  ;;  %v1378_v27 = vsel %vm225_vm0, %v325_v16, %v324_v12  ;;  %s775_s16 = sshll.u32 %s201_s8, 4  ;;  %s762_s24 = scalar_lea.sflag [#allocation4], %s1306_s30  ;;  %s1861_s16 = int_to_ptr.vmem [resolvable:$true] %s775_s16 }
  0x58   : > { %v224_v5 = vrot.slane %v1328_v3, 7  ;;  %342 = vrot.lane.b32.xlu1 %v1361_v20, %s1132_s4  ;;  %v393_v24 = vsub.f32 %v1361_v20, %v1334_v7  ;;  %v392_v25 = vsub.f32 %v323_v21, %v1332_v6  ;;  %v395_v28 = vsub.f32 %v1374_v26, %v1344_v11  ;;  %s1056_s6 = scalar_lea.vmem %s1861_s16, 512  ;;  %p1933_p1 = scmp.ne.s32.totalorder %s1916_s20, 0 }
  0x59   : > { %v394_v29 = vsub.f32 %v1378_v27, %v1337_v8  ;;  %v316_v30 = vrot.slane %v1354_v17, 7  ;;  %v317_v31 = vrot.slane %v1356_v18, 7  ;;  %v586_v34 = vrot.slane %v1354_v17, 1  ;;  %p1057_p13 = scmp.ne.s32.totalorder %s1861_s16, %s1056_s6  ;;  %s1134_s13 = smov [#allocation7]  }
  0x5a   : > { %255 = vrot.lane.b32.xlu0 %v1321_v1, %s1133_s19  ;;  %v227_v15 = vsel %vm225_vm0, %v224_v5, %v223_v4  ;;  %v399_v32 = vmul.f32 %v393_v24, %v393_v24  ;;  %v398_v33 = vmul.f32 %v392_v25, %v392_v25  ;;  %v587_v35 = vrot.slane %v1356_v18, 1  ;;  %s1060_s7 = sshll.u32 %s1134_s13, 4  ;;  %s1061_s7 = int_to_ptr.vmem [resolvable:$false] %s1060_s7 }
  0x5b   : > { %v403_v36 = vmul.f32 %v395_v28, %v395_v28  ;;  %v402_v37 = vmul.f32 %v394_v29, %v394_v29  ;;  %v319_v38 = vsel %vm225_vm0, %v317_v31, %v316_v30  ;;  %v318_v39 = vsel %vm225_vm0, %v316_v30, %v317_v31  ;;  %p1058_p12 = pnand %p1057_p13, %p1933_p1  ;;  %s1062_s14 = scalar_lea.vmem %s1061_s7, 1024 }
  0x5c   : > { %346 = vrot.lane.b32.xlu1 %v1374_v26, %s1132_s4  ;;  %v390_v40 = vsub.f32 %v319_v38, %v1354_v17  ;;  %v391_v41 = vsub.f32 %v318_v39, %v1356_v18  ;;  %v1399_v42 = vsel %vm238_vm1, %v586_v34, %v587_v35  ;;  %v1403_v43 = vsel %vm238_vm1, %v590_v19, %v591_v22  ;;  %p1063_p5 = scmp.lt.s32.totalorder %s1861_s16, %s1061_s7  ;;  %p1064_p7 = scmp.lt.s32.totalorder %s1062_s14, %s1056_s6 }
  0x5d   : > { %v660_v44 = vsub.f32 %v1399_v42, %v1354_v17  ;;  %v662_v45 = vsub.f32 %v1403_v43, %v1332_v6  ;;  %v1413_v46 = vsel %vm238_vm1, %v587_v35, %v586_v34  ;;  %v1420_v51 = vsel %vm238_vm1, %v591_v22, %v590_v19  ;;  %v1460_v35 = vld [vmem:[%s1315_s29 + $0x18] sm:$0xff]  ;;  %p1059_p10 = pneg %p1058_p12 }
  0x5e   : > { %340 = vrot.lane.b32.xlu0 %v323_v21, %s1132_s4  ;;  %v396_v48 = vmul.f32 %v390_v40, %v390_v40  ;;  %v397_v49 = vmul.f32 %v391_v41, %v391_v41  ;;  %v661_v50 = vsub.f32 %v1413_v46, %v1356_v18  ;;  %v1424_v54 = vsel %vm238_vm1, %v594_v23, %v595_v47  ;;  %p1065_p9 = por %p1064_p7, %p1063_p5 }
  0x5f   : > { %v666_v52 = vmul.f32 %v660_v44, %v660_v44  ;;  %v668_v53 = vmul.f32 %v662_v45, %v662_v45  ;;  %v663_v55 = vsub.f32 %v1420_v51, %v1334_v7  ;;  %v664_v59 = vsub.f32 %v1424_v54, %v1337_v8 }
  0x60   : > { %336 = vrot.lane.b32.xlu1 %v319_v38, %s1132_s4  ;;  %v400_v56 = vadd.f32 %v398_v33, %v396_v48  ;;  %v401_v57 = vadd.f32 %v399_v32, %v397_v49  ;;  %v667_v58 = vmul.f32 %v661_v50, %v661_v50  ;;  %v1434_v62 = vsel %vm238_vm1, %v595_v47, %v594_v23  ;;  %v1456_v33 = vld [vmem:[%s1315_s29 + $0x10] sm:$0xff]  ;;  %p1066_p11 = pnand %p1065_p9, %p1059_p10 }
  0x61   : > { %v670_v60 = vadd.f32 %v668_v53, %v666_v52  ;;  %v669_v61 = vmul.f32 %v663_v55, %v663_v55  ;;  %v228_v63 = vsub.s32 %v227_v15, %v1323_v2  ;;  %v672_v10 = vmul.f32 %v664_v59, %v664_v59 }
  0x62   : > { %344 = vrot.lane.b32.xlu0 %v1378_v27, %s1132_s4  ;;  %v404_v0 = vadd.f32 %v402_v37, %v400_v56  ;;  %v405_v9 = vadd.f32 %v403_v36, %v401_v57  ;;  %v665_v12 = vsub.f32 %v1434_v62, %v1344_v11  ;;  %v226_v15 = vsel %vm225_vm0, %v223_v4, %v224_v5  ;;  %v1463_v36 = vld [vmem:[%s1315_s29 + $0x20] sm:$0xff]  ;;  %v1466_v37 = vld [vmem:[%s1315_s29 + $0x28] sm:$0xff] }
  0x63   : > { %v671_v13 = vadd.f32 %v669_v61, %v667_v58  ;;  %v674_v19 = vadd.f32 %v672_v10, %v670_v60  ;;  %v236_v23 = vrot.slane %v1323_v2, 1  ;;  %v237_v24 = vrot.slane %v1328_v3, 1 }
  0x64   : > { %v406_v14 = vsub.f32 0.0, %v404_v0  ;;  %338 = vrot.lane.b32.xlu1 %v318_v39, %s1132_s4  ;;  %v407_v16 = vsub.f32 0.0, %v405_v9  ;;  %v673_v22 = vmul.f32 %v665_v12, %v665_v12  ;;  %v329_v40 = vrot.slane %v1460_v35, 7 }
  0x65   : > { %v676_v29 = vsub.f32 0.0, %v674_v19  ;;  %v239_v4 = vsel %vm238_vm1, %v236_v23, %v237_v24  ;;  %v332_v41 = vrot.slane %v1463_v36, 7  ;;  %v333_v44 = vrot.slane %v1466_v37, 7 }
  0x66   : > { %424 = vrot.lane.b32.xlu0 %v319_v38, %s1133_s19  ;;  %v408_v25 = vmul.f32 1.442695, %v406_v14  ;;  %v410_v28 = vmul.f32 1.442695, %v407_v16  ;;  %v675_v30 = vadd.f32 %v673_v22, %v671_v13  ;;  %v241_v34 = vsub.s32 %v239_v4, %v1323_v2 }
  0x67   : > { %v678_v31 = vmul.f32 1.442695, %v676_v29  ;;  %v240_v38 = vsel %vm238_vm1, %v237_v24, %v236_v23  ;;  %vm230_vm2 = vcmp.ge.s32.totalorder %v228_v63, 4294967295  ;;  %vm232_vm3 = vcmp.le.s32.totalorder %v228_v63, 1 }
  0x68   : > { %956 = vpow2.f32 %v408_v25  ;;  %426 = vrot.lane.b32.xlu1 %v318_v39, %s1133_s19  ;;  %v677_v32 = vsub.f32 0.0, %v675_v30  ;;  %v328_v39 = vrot.slane %v1456_v33, 7  ;;  %vm243_vm6 = vcmp.ge.s32.totalorder %v241_v34, 4294967295  ;;  %vm1488_vm8 = vmand %vm230_vm2, %vm232_vm3 }
  0x69   : > { %958 = vpow2.f32 %v410_v28  ;;  %vm245_vm7 = vcmp.le.s32.totalorder %v241_v34, 1  ;;  %v335_v49 = vsel %vm225_vm0, %v333_v44, %v332_v41  ;;  %v334_v59 = vsel %vm225_vm0, %v332_v41, %v333_v44 }
  0x6a   : > { %428 = vrot.lane.b32.xlu0 %v323_v21, %s1133_s19  ;;  %v229_v21 = vsub.s32 %v226_v15, %v1328_v3  ;;  %960 = vpow2.f32 %v678_v31  ;;  %v680_v5 = vmul.f32 1.442695, %v677_v32  ;;  %v331_v48 = vsel %vm225_vm0, %v329_v40, %v328_v39  ;;  %vm1522_vm12 = vmand %vm243_vm6, %vm245_vm7 }
  0x6b   : > { %v330_v53 = vsel %vm225_vm0, %v328_v39, %v329_v40  ;;  %v271_v14 = vmul.f32 %v1332_v6, %v1332_v6  ;;  %v269_v16 = vmul.f32 %v1354_v17, %v1354_v17  ;;  %v301_v15 = vsub.s32 127, %v1321_v1 }
  0x6c   : > { %430 = vrot.lane.b32.xlu1 %v1361_v20, %s1133_s19  ;;  %962 = vpow2.f32 %v680_v5  ;;  %v1482_v20 = vsel %vm225_vm0, %v1323_v2, 1  ;;  %vm231_vm4 = vcmp.ge.s32.totalorder %v229_v21, 4294967295  ;;  %vm233_vm5 = vcmp.le.s32.totalorder %v229_v21, 1 }
  0x6d   : > { %vm1500_vm9 = vmand %vm231_vm4, %vm233_vm5  ;;  %v270_v24 = vmul.f32 %v1356_v18, %v1356_v18  ;;  %v272_v25 = vmul.f32 %v1334_v7, %v1334_v7  ;;  %v275_v28 = vmul.f32 %v1337_v8, %v1337_v8  ;;  %v273_v29 = vadd.f32 %v271_v14, %v269_v16 }
  0x6e   : > { %432 = vrot.lane.b32.xlu0 %v1378_v27, %s1133_s19  ;;  %v242_v27 = vsub.s32 %v240_v38, %v1328_v3  ;;  %vm299_vm2 = vcmp.lt.s32.totalorder %v1321_v1, 1  ;;  %vm302_vm3 = vcmp.lt.s32.totalorder %v301_v15, 1  ;;  %v290_v31 = vsub.s32 15, %v1328_v3 }
  0x6f   : > { %v274_v32 = vadd.f32 %v272_v25, %v270_v24  ;;  %v276_v4 = vmul.f32 %v1344_v11, %v1344_v11  ;;  %v277_v34 = vadd.f32 %v275_v28, %v273_v29  ;;  %v303_v39 = vsel %vm302_vm3, %v301_v15, 1 }
  0x70   : > { %434 = vrot.lane.b32.xlu1 %v1374_v26, %s1133_s19  ;;  %vm244_vm10 = vcmp.ge.s32.totalorder %v242_v27, 4294967295  ;;  %vm246_vm11 = vcmp.le.s32.totalorder %v242_v27, 1  ;;  %v300_v27 = vsel %vm299_vm2, %v1321_v1, 1  ;;  %v295_v44 = vadd.s32 1, %v1482_v20 }
  0x71   : > { %vm1538_vm13 = vmand %vm244_vm10, %vm246_vm11  ;;  %vm293_vm11 = vcmp.lt.s32.totalorder %v290_v31, 1  ;;  %v278_v40 = vadd.f32 %v276_v4, %v274_v32 }
  0x72   : > { %478 = vrot.lane.b32.xlu0 %v1354_v17, %s1132_s4  ;;  %v957_v45 = vpop.eup %956 }
  0x73   : > { %v959_v50 = vpop.eup %958  ;;  %v1498_v26 = vsel %vm1488_vm8, %v957_v45, 0.0  ;;  %v279_v45 = vsub.f32 0.0, %v277_v34 }
  0x74   : > { %v961_v55 = vpop.eup %960  ;;  %480 = vrot.lane.b32.xlu1 %v1356_v18, %s1132_s4  ;;  %v1509_v56 = vmul.f32 %v1498_v26, %v331_v48  ;;  %v1512_v57 = vmul.f32 %v1498_v26, %v335_v49  ;;  %v1516_v58 = vsel %vm1500_vm9, %v959_v50, 0.0  ;;  %v294_v50 = vsel %vm293_vm11, %v290_v31, 1 }
  0x75   : > { %v1529_v61 = vmul.f32 %v1516_v58, %v330_v53  ;;  %v1532_v63 = vmul.f32 %v1516_v58, %v334_v59  ;;  %v1536_v0 = vsel %vm1522_vm12, %v961_v55, 0.0 }
  0x76   : > { %482 = vrot.lane.b32.xlu0 %v1332_v6, %s1132_s4  ;;  %v963_v9 = vpop.eup %962 }
  0x77   : > { %v1544_v12 = vsel %vm1538_vm13, %v963_v9, 0.0 }
  0x78   : > { %484 = vrot.lane.b32.xlu1 %v1334_v7, %s1132_s4 }
  0x7a   : > { %486 = vrot.lane.b32.xlu0 %v1337_v8, %s1132_s4 }
  0x7c   : > { %488 = vrot.lane.b32.xlu1 %v1344_v11, %s1132_s4 }
  0x7e   : > { %532 = vrot.lane.b32.xlu0 %v1354_v17, %s1133_s19 }
  0x80   : > { %534 = vrot.lane.b32.xlu1 %v1356_v18, %s1133_s19 }
  0x82   : > { %536 = vrot.lane.b32.xlu0 %v1332_v6, %s1133_s19 }
  0x84   : > { %538 = vrot.lane.b32.xlu1 %v1334_v7, %s1133_s19 }
  0x86   : > { %540 = vrot.lane.b32.xlu0 %v1337_v8, %s1133_s19 }
  0x88   : > { %542 = vrot.lane.b32.xlu1 %v1344_v11, %s1133_s19 }
  0x8a   : > { %606 = vrot.lane.b32.xlu0 %v1399_v42, %s1132_s4 }
  0x8c   : > { %608 = vrot.lane.b32.xlu1 %v1413_v46, %s1132_s4 }
  0x8e   : > { %610 = vrot.lane.b32.xlu0 %v1403_v43, %s1132_s4 }
  0x90   : > { %612 = vrot.lane.b32.xlu1 %v1420_v51, %s1132_s4 }
  0x92   : > { %614 = vrot.lane.b32.xlu0 %v1424_v54, %s1132_s4 }
  0x94   : > { %616 = vrot.lane.b32.xlu1 %v1434_v62, %s1132_s4 }
  0x96   : > { %694 = vrot.lane.b32.xlu0 %v1399_v42, %s1133_s19  ;;  %v598_v42 = vrot.slane %v1456_v33, 1 }
  0x98   : > { %696 = vrot.lane.b32.xlu1 %v1413_v46, %s1133_s19 }
  0x9a   : > { %698 = vrot.lane.b32.xlu0 %v1403_v43, %s1133_s19  ;;  %v599_v43 = vrot.slane %v1460_v35, 1 }
  0x9c   : > { %700 = vrot.lane.b32.xlu1 %v1420_v51, %s1133_s19  ;;  %v1610_v46 = vsel %vm238_vm1, %v598_v42, %v599_v43  ;;  %v602_v51 = vrot.slane %v1463_v36, 1  ;;  %v1628_v13 = vsel %vm238_vm1, %v599_v43, %v598_v42  ;;  %v281_v42 = vmul.f32 1.442695, %v279_v45 }
  0x9d   : > { %v296_v43 = vadd.s32 1, %v294_v50  ;;  %v686_v10 = vmul.f32 %v1536_v0, %v1610_v46 }
  0x9e   : > { %702 = vrot.lane.b32.xlu0 %v1424_v54, %s1133_s19  ;;  %v603_v54 = vrot.slane %v1466_v37, 1  ;;  %964 = vpow2.f32 %v281_v42 }
  0x9f   : > { %v298_v29 = vadd.s32 1, %v296_v43 }
  0xa0   : > { %704 = vrot.lane.b32.xlu1 %v1434_v62, %s1133_s19  ;;  %v1620_v62 = vsel %vm238_vm1, %v602_v51, %v603_v54  ;;  %v1642_v23 = vsel %vm238_vm1, %v603_v54, %v602_v51 }
  0xa2   : > { %348 = vrot.lane.b32.xlu0 %v331_v48, %s1132_s4 }
  0xa4   : > { %350 = vrot.lane.b32.xlu1 %v330_v53, %s1132_s4 }
  0xa6   : > { %352 = vrot.lane.b32.xlu0 %v335_v49, %s1132_s4 }
  0xa8   : > { %354 = vrot.lane.b32.xlu1 %v334_v59, %s1132_s4 }
  0xaa   : > { %436 = vrot.lane.b32.xlu0 %v331_v48, %s1133_s19 }
  0xac   : > { %438 = vrot.lane.b32.xlu1 %v330_v53, %s1133_s19  ;;  %v280_v53 = vsub.f32 0.0, %v278_v40 }
  0xae   : > { %440 = vrot.lane.b32.xlu0 %v335_v49, %s1133_s19  ;;  %v283_v24 = vmul.f32 1.442695, %v280_v53 }
  0xb0   : > { %442 = vrot.lane.b32.xlu1 %v334_v59, %s1133_s19  ;;  %v297_v59 = vadd.s32 1, %v295_v44  ;;  %966 = vpow2.f32 %v283_v24 }
  0xb2   : > { %490 = vrot.lane.b32.xlu0 %v1456_v33, %s1132_s4 }
  0xb4   : > { %492 = vrot.lane.b32.xlu1 %v1460_v35, %s1132_s4 }
  0xb6   : > { %494 = vrot.lane.b32.xlu0 %v1463_v36, %s1132_s4 }
  0xb8   : > { %496 = vrot.lane.b32.xlu1 %v1466_v37, %s1132_s4 }
  0xba   : > { %544 = vrot.lane.b32.xlu0 %v1456_v33, %s1133_s19 }
  0xbc   : > { %546 = vrot.lane.b32.xlu1 %v1460_v35, %s1133_s19 }
  0xbe   : > { %548 = vrot.lane.b32.xlu0 %v1463_v36, %s1133_s19 }
  0xc0   : > { %550 = vrot.lane.b32.xlu1 %v1466_v37, %s1133_s19 }
  0xc2   : > { %618 = vrot.lane.b32.xlu0 %v1610_v46, %s1132_s4 }
  0xc4   : > { %620 = vrot.lane.b32.xlu1 %v1628_v13, %s1132_s4 }
  0xc6   : > { %622 = vrot.lane.b32.xlu0 %v1620_v62, %s1132_s4 }
  0xc8   : > { %v250_v19 = vpop.permute.xlu0 %249  ;;  %624 = vrot.lane.b32.xlu1 %v1642_v23, %s1132_s4 }
  0xc9   : > { %v251_v22 = vsub.s32 %v250_v19, %v1321_v1 }
  0xca   : > { %706 = vrot.lane.b32.xlu0 %v1610_v46, %s1133_s19  ;;  %v343_v5 = vpop.permute.xlu1 %342  ;;  %v687_v46 = vmul.f32 %v1544_v12, %v1628_v13 }
  0xcb   : > { %vm252_vm14 = vcmp.ge.s32.totalorder %v251_v22, 4294967295  ;;  %vm253_vm15 = vcmp.le.s32.totalorder %v251_v22, 1  ;;  %v359_v19 = vsub.f32 %v343_v5, %v1334_v7 }
  0xcc   : > { %vm1650_vm0 = vmand %vm252_vm14, %vm253_vm15  ;;  %v256_v21 = vpop.permute.xlu0 %255  ;;  %708 = vrot.lane.b32.xlu1 %v1628_v13, %s1133_s19 }
  0xcd   : > { %v257_v2 = vsub.s32 %v256_v21, %v1321_v1  ;;  %vm261_vm1 = vmand %vm1488_vm8, %vm1650_vm0  ;;  %v304_v1 = vadd.s32 %v303_v39, %v300_v27 }
  0xce   : > { %710 = vrot.lane.b32.xlu0 %v1620_v62, %s1133_s19  ;;  %vm262_vm4 = vmand %vm1500_vm9, %vm1650_vm0  ;;  %v347_v41 = vpop.permute.xlu1 %346 }
  0xcf   : > { %vm258_vm5 = vcmp.ge.s32.totalorder %v257_v2, 4294967295  ;;  %vm259_vm6 = vcmp.le.s32.totalorder %v257_v2, 1  ;;  %vm265_vm7 = vmand %vm1522_vm12, %vm1650_vm0  ;;  %v305_v9 = vadd.s32 1, %v304_v1  ;;  %v361_v21 = vsub.f32 %v347_v41, %v1344_v11 }
  0xd0   : > { %vm1675_vm10 = vmand %vm258_vm5, %vm259_vm6  ;;  %v341_v38 = vpop.permute.xlu0 %340  ;;  %712 = vrot.lane.b32.xlu1 %v1642_v23, %s1133_s19 }
  0xd1   : > { %vm263_vm14 = vmand %vm1488_vm8, %vm1675_vm10  ;;  %v358_v48 = vsub.f32 %v341_v38, %v1332_v6  ;;  %v306_v28 = vmul.u32 %v305_v9, %v297_v59  ;;  %v365_v38 = vmul.f32 %v359_v19, %v359_v19  ;;  %v307_v1 = vmul.u32 %v305_v9, %v298_v29  ;;  %v965_v19 = vpop.eup %964 }
  0xd2   : > { %vm264_vm15 = vmand %vm1500_vm9, %vm1675_vm10  ;;  %v337_v55 = vpop.permute.xlu1 %336  ;;  %v369_v45 = vmul.f32 %v361_v21, %v361_v21 }
  0xd3   : > { %vm266_vm2 = vmand %vm1538_vm13, %vm1650_vm0  ;;  %v364_v51 = vmul.f32 %v358_v48, %v358_v48  ;;  %v356_v54 = vsub.f32 %v337_v55, %v1354_v17  ;;  %v308_v44 = vsub.s32 9, %v306_v28 }
  0xd4   : > { %v345_v49 = vpop.permute.xlu0 %344  ;;  %vm267_vm3 = vmand %vm1522_vm12, %vm1675_vm10 }
  0xd5   : > { %vm268_vm5 = vmand %vm1538_vm13, %vm1675_vm10  ;;  %v360_v20 = vsub.f32 %v345_v49, %v1337_v8  ;;  %v362_v15 = vmul.f32 %v356_v54, %v356_v54  ;;  %v310_v43 = vcvt.s32.f32 %v308_v44 }
  0xd6   : > { %v339_v25 = vpop.permute.xlu1 %338 }
  0xd7   : > { %v368_v22 = vmul.f32 %v360_v20, %v360_v20  ;;  %v366_v2 = vadd.f32 %v364_v51, %v362_v15  ;;  %v357_v31 = vsub.f32 %v339_v25, %v1356_v18  ;;  %v309_v51 = vsub.s32 9, %v307_v1 }
  0xd8   : > { %v425_v14 = vpop.permute.xlu0 %424 }
  0xd9   : > { %v444_v16 = vsub.f32 %v425_v14, %v1354_v17  ;;  %v370_v27 = vadd.f32 %v368_v22, %v366_v2  ;;  %v363_v39 = vmul.f32 %v357_v31, %v357_v31  ;;  %v311_v21 = vcvt.s32.f32 %v309_v51  ;;  %v967_v2 = vpop.eup %966 }
  0xda   : > { %v427_v40 = vpop.permute.xlu1 %426 }
  0xdb   : > { %v450_v4 = vmul.f32 %v444_v16, %v444_v16  ;;  %v372_v48 = vsub.f32 0.0, %v370_v27  ;;  %v367_v49 = vadd.f32 %v365_v38, %v363_v39  ;;  %v445_v14 = vsub.f32 %v427_v40, %v1356_v18 }
  0xdc   : > { %v429_v32 = vpop.permute.xlu0 %428 }
  0xdd   : > { %v446_v34 = vsub.f32 %v429_v32, %v1332_v6  ;;  %v374_v53 = vmul.f32 1.442695, %v372_v48  ;;  %v371_v55 = vadd.f32 %v369_v45, %v367_v49  ;;  %v451_v31 = vmul.f32 %v445_v14, %v445_v14 }
  0xde   : > { %v431_v42 = vpop.permute.xlu1 %430  ;;  %v313_v45 = vmul.f32 %v967_v2, %v311_v21 }
  0xdf   : > { %v452_v5 = vmul.f32 %v446_v34, %v446_v34  ;;  %968 = vpow2.f32 %v374_v53  ;;  %v373_v54 = vsub.f32 0.0, %v371_v55  ;;  %v447_v16 = vsub.f32 %v431_v42, %v1334_v7 }
  0xe0   : > { %v433_v50 = vpop.permute.xlu0 %432  ;;  %v312_v34 = vmul.f32 %v965_v19, %v310_v43  ;;  %v315_v51 = vadd.f32 1.0, %v313_v45 }
  0xe1   : > { %v454_v41 = vadd.f32 %v452_v5, %v450_v4  ;;  %v448_v20 = vsub.f32 %v433_v50, %v1337_v8  ;;  %v376_v24 = vmul.f32 1.442695, %v373_v54  ;;  %v453_v25 = vmul.f32 %v447_v16, %v447_v16 }
  0xe2   : > { %v435_v29 = vpop.permute.xlu1 %434  ;;  %v314_v50 = vadd.f32 1.0, %v312_v34 }
  0xe3   : > { %v456_v59 = vmul.f32 %v448_v20, %v448_v20  ;;  %970 = vpow2.f32 %v376_v24  ;;  %v449_v32 = vsub.f32 %v435_v29, %v1344_v11  ;;  %v455_v5 = vadd.f32 %v453_v25, %v451_v31 }
  0xe4   : > { %v479_v9 = vpop.permute.xlu0 %478 }
  0xe5   : > { %v458_v22 = vadd.f32 %v456_v59, %v454_v41  ;;  %v498_v15 = vsub.f32 %v479_v9, %v1354_v17  ;;  %v457_v40 = vmul.f32 %v449_v32, %v449_v32 }
  0xe6   : > { %v481_v1 = vpop.permute.xlu1 %480 }
  0xe7   : > { %v460_v28 = vsub.f32 0.0, %v458_v22  ;;  %v504_v27 = vmul.f32 %v498_v15, %v498_v15  ;;  %v459_v48 = vadd.f32 %v457_v40, %v455_v5  ;;  %v499_v14 = vsub.f32 %v481_v1, %v1356_v18 }
  0xe8   : > { %v483_v4 = vpop.permute.xlu0 %482 }
  0xe9   : > { %v462_v38 = vmul.f32 1.442695, %v460_v28  ;;  %v500_v39 = vsub.f32 %v483_v4, %v1332_v6  ;;  %v969_v53 = vpop.eup %968  ;;  %v461_v55 = vsub.f32 0.0, %v459_v48  ;;  %v505_v31 = vmul.f32 %v499_v14, %v499_v14 }
  0xea   : > { %v485_v42 = vpop.permute.xlu1 %484  ;;  %v1725_v43 = vsel %vm261_vm1, %v969_v53, 0.0 }
  0xeb   : > { %972 = vpow2.f32 %v462_v38  ;;  %v506_v44 = vmul.f32 %v500_v39, %v500_v39  ;;  %v464_v54 = vmul.f32 1.442695, %v461_v55  ;;  %v501_v16 = vsub.f32 %v485_v42, %v1334_v7 }
  0xec   : > { %v487_v49 = vpop.permute.xlu0 %486  ;;  %v380_v19 = vadd.f32 %v1725_v43, %v314_v50 }
  0xed   : > { %v508_v41 = vadd.f32 %v506_v44, %v504_v27  ;;  %v502_v20 = vsub.f32 %v487_v49, %v1337_v8  ;;  %v971_v24 = vpop.eup %970  ;;  %974 = vpow2.f32 %v464_v54  ;;  %v507_v25 = vmul.f32 %v501_v16, %v501_v16 }
  0xee   : > { %v414_v28 = vadd.f32 %v1498_v26, %v380_v19  ;;  %v489_v21 = vpop.permute.xlu1 %488  ;;  %v1737_v2 = vsel %vm262_vm4, %v971_v24, 0.0 }
  0xef   : > { %v510_v59 = vmul.f32 %v502_v20, %v502_v20  ;;  %v503_v32 = vsub.f32 %v489_v21, %v1344_v11  ;;  %v381_v34 = vadd.f32 %v1737_v2, %v315_v51  ;;  %v509_v5 = vadd.f32 %v507_v25, %v505_v31 }
  0xf0   : > { %v533_v9 = vpop.permute.xlu0 %532 }
  0xf1   : > { %v512_v22 = vadd.f32 %v510_v59, %v508_v41  ;;  %v552_v15 = vsub.f32 %v533_v9, %v1354_v17  ;;  %v511_v40 = vmul.f32 %v503_v32, %v503_v32  ;;  %v415_v1 = vadd.f32 %v1516_v58, %v381_v34 }
  0xf2   : > { %v535_v48 = vpop.permute.xlu1 %534 }
  0xf3   : > { %v514_v29 = vsub.f32 0.0, %v512_v22  ;;  %v558_v39 = vmul.f32 %v552_v15, %v552_v15  ;;  %v513_v50 = vadd.f32 %v511_v40, %v509_v5  ;;  %v553_v54 = vsub.f32 %v535_v48, %v1356_v18 }
  0xf4   : > { %v537_v4 = vpop.permute.xlu0 %536 }
  0xf5   : > { %v973_v38 = vpop.eup %972  ;;  %v516_v27 = vmul.f32 1.442695, %v514_v29  ;;  %v554_v26 = vsub.f32 %v537_v4, %v1332_v6  ;;  %v515_v55 = vsub.f32 0.0, %v513_v50 }
  0xf6   : > { %v1747_v44 = vsel %vm263_vm14, %v973_v38, 0.0  ;;  %v539_v47 = vpop.permute.xlu1 %538 }
  0xf7   : > { %976 = vpow2.f32 %v516_v27  ;;  %v560_v45 = vmul.f32 %v554_v26, %v554_v26  ;;  %v468_v49 = vadd.f32 %v1747_v44, %v414_v28  ;;  %v975_v42 = vpop.eup %974  ;;  %v518_v51 = vmul.f32 1.442695, %v515_v55 }
  0xf8   : > { %v541_v41 = vpop.permute.xlu0 %540  ;;  %v555_v14 = vsub.f32 %v539_v47, %v1334_v7  ;;  %v1760_v19 = vsel %vm264_vm15, %v975_v42, 0.0  ;;  %v559_v28 = vmul.f32 %v553_v54, %v553_v54 }
  0xf9   : > { %v562_v20 = vadd.f32 %v560_v45, %v558_v39  ;;  %v556_v53 = vsub.f32 %v541_v41, %v1337_v8  ;;  %978 = vpow2.f32 %v518_v51  ;;  %v469_v15 = vadd.f32 %v1760_v19, %v415_v1 }
  0xfa   : > { %v561_v22 = vmul.f32 %v555_v14, %v555_v14  ;;  %v543_v25 = vpop.permute.xlu1 %542 }
  0xfb   : > { %v564_v59 = vmul.f32 %v556_v53, %v556_v53  ;;  %v557_v29 = vsub.f32 %v543_v25, %v1344_v11 }
  0xfc   : > { %v607_v58 = vpop.permute.xlu0 %606  ;;  %v563_v34 = vadd.f32 %v561_v22, %v559_v28 }
  0xfd   : > { %v566_v16 = vadd.f32 %v564_v59, %v562_v20  ;;  %v626_v9 = vsub.f32 %v607_v58, %v1354_v17  ;;  %v565_v38 = vmul.f32 %v557_v29, %v557_v29 }
  0xfe   : > { %v609_v26 = vpop.permute.xlu1 %608 }
  0xff   : > { %v568_v24 = vsub.f32 0.0, %v566_v16  ;;  %v632_v4 = vmul.f32 %v626_v9, %v626_v9  ;;  %v567_v40 = vadd.f32 %v565_v38, %v563_v34  ;;  %v627_v59 = vsub.f32 %v609_v26, %v1356_v18 }
 0x100   : > { %v611_v21 = vpop.permute.xlu0 %610 }
 0x101   : > { %v977_v31 = vpop.eup %976  ;;  %v570_v32 = vmul.f32 1.442695, %v568_v24  ;;  %v628_v52 = vsub.f32 %v611_v21, %v1332_v6  ;;  %v569_v50 = vsub.f32 0.0, %v567_v40  ;;  %v633_v22 = vmul.f32 %v627_v59, %v627_v59 }
 0x102   : > { %v1767_v27 = vsel %vm1650_vm0, %v977_v31, 0.0  ;;  %v613_v20 = vpop.permute.xlu1 %612 }
 0x103   : > { %980 = vpow2.f32 %v570_v32  ;;  %v634_v39 = vmul.f32 %v628_v52, %v628_v52  ;;  %v522_v5 = vadd.f32 %v1767_v27, %v468_v49  ;;  %v979_v53 = vpop.eup %978  ;;  %v572_v55 = vmul.f32 1.442695, %v569_v50 }
 0x104   : > { %v615_v1 = vpop.permute.xlu0 %614  ;;  %v629_v47 = vsub.f32 %v613_v20, %v1334_v7  ;;  %v1776_v49 = vsel %vm1650_vm0, %v979_v53, 0.0 }
 0x105   : > { %v636_v45 = vadd.f32 %v634_v39, %v632_v4  ;;  %v630_v48 = vsub.f32 %v615_v1, %v1337_v8  ;;  %982 = vpow2.f32 %v572_v55  ;;  %v523_v58 = vadd.f32 %v1776_v49, %v469_v15 }
 0x106   : > { %v635_v14 = vmul.f32 %v629_v47, %v629_v47  ;;  %v617_v9 = vpop.permute.xlu1 %616 }
 0x107   : > { %v638_v41 = vmul.f32 %v630_v48, %v630_v48  ;;  %v631_v24 = vsub.f32 %v617_v9, %v1344_v11 }
 0x108   : > { %v695_v42 = vpop.permute.xlu0 %694 }
 0x109   : > { %v640_v51 = vadd.f32 %v638_v41, %v636_v45  ;;  %v714_v54 = vsub.f32 %v695_v42, %v1354_v17  ;;  %v637_v17 = vadd.f32 %v635_v14, %v633_v22  ;;  %v639_v32 = vmul.f32 %v631_v24, %v631_v24 }
 0x10a   : > { %v697_v15 = vpop.permute.xlu1 %696 }
 0x10b   : > { %v642_v16 = vsub.f32 0.0, %v640_v51  ;;  %v720_v21 = vmul.f32 %v714_v54, %v714_v54  ;;  %v641_v38 = vadd.f32 %v639_v32, %v637_v17  ;;  %v715_v41 = vsub.f32 %v697_v15, %v1356_v18 }
 0x10c   : > { %v699_v25 = vpop.permute.xlu0 %698 }
 0x10d   : > { %v981_v28 = vpop.eup %980  ;;  %v644_v29 = vmul.f32 1.442695, %v642_v16  ;;  %v716_v31 = vsub.f32 %v699_v25, %v1332_v6  ;;  %v643_v1 = vsub.f32 0.0, %v641_v38  ;;  %v721_v14 = vmul.f32 %v715_v41, %v715_v41 }
 0x10e   : > { %v1783_v4 = vsel %vm1675_vm10, %v981_v28, 0.0  ;;  %v701_v48 = vpop.permute.xlu1 %700 }
 0x10f   : > { %984 = vpow2.f32 %v644_v29  ;;  %v722_v52 = vmul.f32 %v716_v31, %v716_v31  ;;  %v576_v34 = vadd.f32 %v1783_v4, %v522_v5  ;;  %v983_v6 = vpop.eup %982  ;;  %v646_v50 = vmul.f32 1.442695, %v643_v1 }
 0x110   : > { %v703_v39 = vpop.permute.xlu0 %702  ;;  %v717_v20 = vsub.f32 %v701_v48, %v1334_v7  ;;  %v1792_v5 = vsel %vm1675_vm10, %v983_v6, 0.0 }
 0x111   : > { %v724_v26 = vadd.f32 %v722_v52, %v720_v21  ;;  %v718_v40 = vsub.f32 %v703_v39, %v1337_v8  ;;  %986 = vpow2.f32 %v646_v50  ;;  %v577_v8 = vadd.f32 %v1792_v5, %v523_v58 }
 0x112   : > { %v723_v47 = vmul.f32 %v717_v20, %v717_v20  ;;  %v705_v54 = vpop.permute.xlu1 %704 }
 0x113   : > { %v726_v45 = vmul.f32 %v718_v40, %v718_v40  ;;  %v719_v18 = vsub.f32 %v705_v54, %v1344_v11 }
 0x114   : > { %v349_v53 = vpop.permute.xlu0 %348  ;;  %v725_v25 = vadd.f32 %v723_v47, %v721_v14 }
 0x115   : > { %v728_v55 = vadd.f32 %v726_v45, %v724_v26  ;;  %v382_v59 = vmul.f32 %v1725_v43, %v349_v53  ;;  %v727_v28 = vmul.f32 %v719_v18, %v719_v18 }
 0x116   : > { %v351_v11 = vpop.permute.xlu1 %350 }
 0x117   : > { %v730_v42 = vsub.f32 0.0, %v728_v55  ;;  %v384_v51 = vadd.f32 %v1456_v33, %v382_v59  ;;  %v729_v21 = vadd.f32 %v727_v28, %v725_v25 }
 0x118   : > { %v353_v7 = vpop.permute.xlu0 %352 }
 0x119   : > { %v985_v16 = vpop.eup %984  ;;  %v732_v9 = vmul.f32 1.442695, %v730_v42  ;;  %v386_v22 = vmul.f32 %v1725_v43, %v353_v7  ;;  %v418_v24 = vadd.f32 %v1509_v56, %v384_v51  ;;  %v383_v43 = vmul.f32 %v1737_v2, %v351_v11 }
 0x11a   : > { %v1804_v58 = vsel %vm265_vm7, %v985_v16, 0.0  ;;  %v731_v52 = vsub.f32 0.0, %v729_v21  ;;  %v355_v39 = vpop.permute.xlu1 %354 }
 0x11b   : > { %988 = vpow2.f32 %v732_v9  ;;  %v388_v33 = vadd.f32 %v1463_v36, %v386_v22  ;;  %v650_v29 = vadd.f32 %v1804_v58, %v576_v34  ;;  %v385_v15 = vadd.f32 %v1460_v35, %v383_v43  ;;  %v987_v26 = vpop.eup %986 }
 0x11c   : > { %v437_v31 = vpop.permute.xlu0 %436  ;;  %v734_v36 = vmul.f32 1.442695, %v731_v52  ;;  %v387_v40 = vmul.f32 %v1737_v2, %v355_v39 }
 0x11d   : > { %v470_v56 = vmul.f32 %v1747_v44, %v437_v31  ;;  %v422_v17 = vadd.f32 %v1512_v57, %v388_v33  ;;  %v684_v32 = vadd.f32 %v1536_v0, %v650_v29  ;;  %v419_v1 = vadd.f32 %v1529_v61, %v385_v15 }
 0x11e   : > { %v1821_v57 = vsel %vm266_vm2, %v987_v26, 0.0  ;;  %990 = vpow2.f32 %v734_v36  ;;  %v389_v35 = vadd.f32 %v1466_v37, %v387_v40  ;;  %v439_v50 = vpop.permute.xlu1 %438 }
 0x11f   : > { %v472_v38 = vadd.f32 %v470_v56, %v418_v24  ;;  %v651_v48 = vadd.f32 %v1821_v57, %v577_v8  ;;  %v471_v2 = vmul.f32 %v1760_v19, %v439_v50 }
 0x120   : > { %v441_v34 = vpop.permute.xlu0 %440  ;;  %v423_v61 = vadd.f32 %v1532_v63, %v389_v35 }
 0x121   : > { %v474_v45 = vmul.f32 %v1747_v44, %v441_v34  ;;  %v685_v44 = vadd.f32 %v1544_v12, %v651_v48  ;;  %v473_v53 = vadd.f32 %v471_v2, %v419_v1 }
 0x122   : > { %v443_v59 = vpop.permute.xlu1 %442 }
 0x123   : > { %v476_v6 = vadd.f32 %v474_v45, %v422_v17  ;;  %v475_v8 = vmul.f32 %v1760_v19, %v443_v59 }
 0x124   : > { %v491_v41 = vpop.permute.xlu0 %490 }
 0x125   : > { %v989_v20 = vpop.eup %988  ;;  %v524_v30 = vmul.f32 %v1767_v27, %v491_v41  ;;  %v477_v51 = vadd.f32 %v475_v8, %v423_v61 }
 0x126   : > { %v736_v37 = vsel %vm267_vm3, %v989_v20, 0.0  ;;  %v493_v14 = vpop.permute.xlu1 %492 }
 0x127   : > { %v526_v55 = vadd.f32 %v524_v30, %v472_v38  ;;  %v738_v47 = vadd.f32 %v736_v37, %v684_v32  ;;  %v525_v7 = vmul.f32 %v1776_v49, %v493_v14 }
 0x128   : > { %v495_v42 = vpop.permute.xlu0 %494  ;;  %v991_v18 = vpop.eup %990 }
 0x129   : > { %v528_v63 = vmul.f32 %v1767_v27, %v495_v42  ;;  %v737_v9 = vsel %vm268_vm5, %v991_v18, 0.0  ;;  %v527_v22 = vadd.f32 %v525_v7, %v473_v53  ;;  %992 = vrcp.f32 %v738_v47 }
 0x12a   : > { %v739_v19 = vadd.f32 %v737_v9, %v685_v44  ;;  %v497_v25 = vpop.permute.xlu1 %496 }
 0x12b   : > { %v530_v54 = vadd.f32 %v528_v63, %v476_v6  ;;  %v529_v27 = vmul.f32 %v1776_v49, %v497_v25 }
 0x12c   : > { %v545_v16 = vpop.permute.xlu0 %544  ;;  %994 = vrcp.f32 %v739_v19 }
 0x12d   : > { %v578_v60 = vmul.f32 %v1783_v4, %v545_v16  ;;  %v531_v11 = vadd.f32 %v529_v27, %v477_v51 }
 0x12e   : > { %v547_v21 = vpop.permute.xlu1 %546 }
 0x12f   : > { %v580_v24 = vadd.f32 %v578_v60, %v526_v55  ;;  %v579_v43 = vmul.f32 %v1792_v5, %v547_v21 }
 0x130   : > { %v549_v28 = vpop.permute.xlu0 %548 }
 0x131   : > { %v582_v33 = vmul.f32 %v1783_v4, %v549_v28  ;;  %v581_v56 = vadd.f32 %v579_v43, %v527_v22  ;;  %v690_v4 = vmul.f32 %v1536_v0, %v1620_v62  ;;  %v691_v62 = vmul.f32 %v1544_v12, %v1642_v23 }
 0x132   : > { %v551_v32 = vpop.permute.xlu1 %550 }
 0x133   : > { %v584_v29 = vadd.f32 %v582_v33, %v530_v54  ;;  %v583_v49 = vmul.f32 %v1792_v5, %v551_v32  ;;  %v993_v0 = vpop.eup %992 }
 0x134   : > { %v619_v31 = vpop.permute.xlu0 %618 }
 0x135   : > { %v652_v3 = vmul.f32 %v1804_v58, %v619_v31  ;;  %v585_v39 = vadd.f32 %v583_v49, %v531_v11 }
 0x136   : > { %v621_v36 = vpop.permute.xlu1 %620  ;;  %v995_v59 = vpop.eup %994 }
 0x137   : > { %v654_v17 = vadd.f32 %v652_v3, %v580_v24  ;;  %v653_v40 = vmul.f32 %v1821_v57, %v621_v36 }
 0x138   : > { %v623_v52 = vpop.permute.xlu0 %622 }
 0x139   : > { %v656_v15 = vmul.f32 %v1804_v58, %v623_v52  ;;  %v688_v38 = vadd.f32 %v686_v10, %v654_v17  ;;  %v655_v5 = vadd.f32 %v653_v40, %v581_v56 }
 0x13a   : > { %v625_v48 = vpop.permute.xlu1 %624 }
 0x13b   : > { %v658_v26 = vadd.f32 %v656_v15, %v584_v29  ;;  %v657_v58 = vmul.f32 %v1821_v57, %v625_v48  ;;  %v689_v50 = vadd.f32 %v687_v46, %v655_v5 }
 0x13c   : > { %v707_v34 = vpop.permute.xlu0 %706 }
 0x13d   : > { %v740_v1 = vmul.f32 %v736_v37, %v707_v34  ;;  %v692_v45 = vadd.f32 %v690_v4, %v658_v26  ;;  %v659_v41 = vadd.f32 %v657_v58, %v585_v39 }
 0x13e   : > { %v709_v44 = vpop.permute.xlu1 %708 }
 0x13f   : > { %v742_v35 = vadd.f32 %v740_v1, %v688_v38  ;;  %v741_v20 = vmul.f32 %v737_v9, %v709_v44  ;;  %v693_v30 = vadd.f32 %v691_v62, %v659_v41 }
 0x140   : > { %v711_v6 = vpop.permute.xlu0 %710 }
 0x141   : > { %v752_v2 = vmul.f32 %v993_v0, %v742_v35  ;;  %v744_v13 = vmul.f32 %v736_v37, %v711_v6  ;;  %v743_v55 = vadd.f32 %v741_v20, %v689_v50 }
 0x142   : > { %v713_v12 = vpop.permute.xlu1 %712 }
 0x143   : > { %754 = vst [vmem:[%s201_s8] sm:$0xff] %v752_v2  ;;  %v746_v61 = vadd.f32 %v744_v13, %v692_v45  ;;  %v753_v23 = vmul.f32 %v995_v59, %v743_v55  ;;  %v745_v57 = vmul.f32 %v737_v9, %v713_v12 }
 0x145   : > { %v756_v53 = vmul.f32 %v993_v0, %v746_v61  ;;  %755 = vst [vmem:[%s201_s8 + $0x8] sm:$0xff] %v753_v23  ;;  %v747_v37 = vadd.f32 %v745_v57, %v693_v30 }
 0x147   : > { %886 = vst [vmem:[%s201_s8 + $0x10] sm:$0xff] %v756_v53  ;;  %v757_v47 = vmul.f32 %v995_v59, %v747_v37 }
 0x149   : > { %887 = vst [vmem:[%s201_s8 + $0x18] sm:$0xff] %v757_v47 }
 0x14a   : > { %1069 = shalt.err (!%p1066_p11)
}
 0x14b   : > { %s1070_s3 = scalar_lea.hbm %s1866_s26, 512  ;;  %s1074_s22 = scalar_lea.hbm %s1912_s2, 1024 }
 0x14c   : > { %p1071_p3 = scmp.ne.s32.totalorder %s1866_s26, %s1070_s3  ;;  %p1075_p2 = scmp.lt.u32.totalorder %s1866_s26, %s1912_s2 }
 0x14d   : > { %p1076_p4 = scmp.lt.u32.totalorder %s1074_s22, %s1070_s3  ;;  %p1078_p13 = scmp.lt.u32.totalorder %s1070_s3, %s1866_s26 }
 0x14e   : > { %p1072_p8 = pnand %p1071_p3, %p1933_p1 }
 0x14f   : > { %p1077_p6 = por %p1076_p4, %p1075_p2 }
 0x150   : > { %p1073_p0 = pneg %p1072_p8 }
 0x151   : > { %p1079_p12 = por %p1078_p13, %p1077_p6 }
 0x153   : > { %p1080_p10 = pnand %p1079_p12, %p1073_p0 }
 0x155   : > { %1083 = shalt.err (!%p1080_p10)
}
 0x156   : > { %s1135_s19 = smov 128   ;;  %s1136_s5 = smov 8  }
 0x157   : > { %903 = dma.vmem_to_hbm [thread:$0]  (%p1933_p1), %s1861_s16, 512, %s1866_s26, %s762_s24, %s1135_s19, %s1135_s19, %s1136_s5  }
 0x158 PF: > { %s790_s8 = sand.u32 1, %s1114_s9   ;;  %p1934_p5 = scmp.ne.s32.totalorder %s1917_s21, 0 }
 0x159   : > { %p1935_p7 = scmp.ge.s32.totalorder %s1126_s12, 2  ;;  %s791_s27 = scalar_lea.sflag [#allocation4], %s790_s8 }
 0x15b   : > { %p913_p9 = pnand %p1935_p7, %p1934_p5 }
 0x15d   : > { %1109 = dma.done.wait (!%p913_p9), %s791_s27, 512  }
 0x15e   : > { %1111 = vsyncadd (!%p913_p9), %s791_s27, 4294966784  ;;  %p18_p11 = scmp.ge.s32.totalorder %s1177_s15, 4   ;;  %s1936_s9 = smov %s1118_s10 }
 0x15f   : > { %s1937_s10 = smov %s1122_s11  ;;  %s1938_s11 = smov %s1189_s18 }
 0x160   : > { %s1939_s12 = smov %s1177_s15  ;;  %20 = sbr.rel (!%p18_p11) target bundleno = 7 (0x7), region = 91 }
 0x167   :  { %796 = vsyncpa [#allocation3], 1 }
 0x168   :  { %798 = vsyncpa [#allocation3 + $0x1], 1 }
 0x169   :  { %799 = vsyncpa [#allocation6], 1 }
 0x16a   :  { %801 = vsyncpa [#allocation6 + $0x1], 1 }
 0x16b   :  { %802 = vsyncpa [#allocation4], 1 }
 0x16c   :  { %804 = vsyncpa [#allocation4 + $0x1], 1 }

</bundles_post_ra>
